<compile_context>
chip_gen: v6e
topology: v6e:2x2x1
jax: 0.10.0
libtpu: 0.0.40
codegen_flags: <defaults>
</compile_context>

<pallas_src>
import math
import functools

import jax
import jax.numpy as jnp
from jax.experimental import pallas as pl
from jax.experimental.pallas import tpu as pltpu


def _gelu_tanh(x):
    # GELU(approximate='tanh') as in PyTorch.
    c = math.sqrt(2.0 / math.pi)
    return 0.5 * x * (1.0 + jnp.tanh(c * (x + 0.044715 * x * x * x)))


def _layernorm(x, w, b, eps=1e-5):
    mu = jnp.mean(x, axis=-1, keepdims=True)
    var = jnp.mean((x - mu) ** 2, axis=-1, keepdims=True)
    return (x - mu) * jax.lax.rsqrt(var + eps) * w + b


def _pick_chunk(T, pref=256):
    """Largest chunk <= pref that divides T (falls back to T: always correct)."""
    if T <= pref:
        return T
    for cand in (pref, pref // 2, pref // 4, 32, 16):
        if cand and T % cand == 0:
            return cand
    return T


def _pick_q_tile(T, C, n_head, vmem_cap):
    """Query tile sized against a per-generation VMEM budget for attention intermediates."""
    if T <= 256:
        return T
    tk = _pick_chunk(T)
    budget = vmem_cap // 8
    for cand in (256, 128, 64, 32, 16):
        if T % cand:
            continue
        need = n_head * cand * (3 * max(tk, 128) + max(C // n_head, 128)) * 4
        if need <= budget:
            return cand
    return 16 if T % 16 == 0 else T


def _pick_mlp_chunk(h4):
    for cand in (512, 256, 128):
        if h4 >= cand and h4 % cand == 0:
            return cand
    return h4


def _vmem_capacity_bytes():
    try:
        info = pltpu.get_tpu_info()
        for attr in ("vmem_capacity_bytes", "vmem_size_bytes", "vmem_bytes"):
            v = getattr(info, attr, None)
            if v:
                return int(v)
    except Exception:
        pass
    return 128 << 20


def _vmem_estimate_bytes(weights, T, C, tq, tk, t_ln, n_head):
    lane = 128
    hd = C // n_head
    pad = lambda n: ((n + lane - 1) // lane) * lane
    wbytes = sum(int(w.size) * w.dtype.itemsize for w in weights)
    scratch = 3 * n_head * T * pad(hd) * 2             # Q/K/V (bf16)
    scratch += 2 * n_head * tq * lane * 4               # running max / denom
    scratch += n_head * tq * pad(hd) * 4                # running numerator
    scratch += tq * pad(C) * 2                          # head-concat buffer
    attn = 3 * n_head * tq * pad(tk) * 4                # score / prob transients
    qkv = 3 * t_ln * pad(3 * C) * 4                     # LN1+QKV chunk transients
    mlp = 4 * tq * pad(min(4 * C, 512)) * 4
    io = 2 * T * pad(C) * 4 + 2 * tq * pad(C) * 4       # resident x + double-buffered out
    return wbytes + scratch + max(attn + mlp, qkv) + io + (6 << 20)


def block_kernel(n_head, t_ln, tk, approx_recip,
                 x_ref,
                 ln1_w_ref, ln1_b_ref,
                 attn_w_ref, attn_b_ref,
                 proj_w_ref, proj_b_ref,
                 ln2_w_ref, ln2_b_ref,
                 fc_w_ref, fc_b_ref,
                 mlp_proj_w_ref, mlp_proj_b_ref,
                 o_ref,
                 q_scr, k_scr, v_scr,
                 m_scr, l_scr, acc_scr, ocat_scr):
    T, C = x_ref.shape[1], x_ref.shape[2]
    tq = o_ref.shape[1]
    hd = C // n_head
    scale = 1.0 / math.sqrt(hd)
    bf16 = jnp.bfloat16
    qi = pl.program_id(1)

    # ---------- once per batch element: LN1 + fused QKV projection (chunked over T) ----------
    @pl.when(qi == 0)
    def _():
        for ci in range(T // t_ln):
            r0 = ci * t_ln
            x_c = x_ref[0, r0:r0 + t_ln, :]                                      # (t_ln, C) f32
            h1 = _layernorm(x_c, ln1_w_ref[0], ln1_b_ref[0])
            qkv = jnp.dot(h1.astype(bf16), attn_w_ref[...],
                          preferred_element_type=jnp.float32) + attn_b_ref[0]    # (t_ln, 3C) f32
            qkv = qkv.astype(bf16)
            for hh in range(n_head):
                lo = hh * hd
                q_scr[hh, r0:r0 + t_ln, :] = qkv[:, lo:lo + hd]
                k_scr[hh, r0:r0 + t_ln, :] = qkv[:, C + lo:C + lo + hd]
                v_scr[hh, r0:r0 + t_ln, :] = qkv[:, 2 * C + lo:2 * C + lo + hd]

    # ---------- per query tile: flash-style causal attention over KV chunks ----------
    row0 = pl.multiple_of(qi * tq, tq)
    if tq == T:
        q_t = q_scr[...]                                  # (nh, tq, hd) bf16
        x_tile = x_ref[0]                                 # (tq, C) f32
    else:
        q_t = q_scr[:, pl.ds(row0, tq), :]
        x_tile = x_ref[0, pl.ds(row0, tq), :]

    m_scr[...] = jnp.full(m_scr.shape, -1e30, m_scr.dtype)
    l_scr[...] = jnp.zeros(l_scr.shape, l_scr.dtype)
    acc_scr[...] = jnp.zeros(acc_scr.shape, acc_scr.dtype)

    for j in range(T // tk):
        k0 = j * tk

        @pl.when(k0 < row0 + tq)        # skip KV chunks entirely above the causal diagonal
        def _(k0=k0):
            k_c = k_scr[:, k0:k0 + tk, :]                 # (nh, tk, hd) bf16
            v_c = v_scr[:, k0:k0 + tk, :]
            s = jnp.einsum("htd,hsd->hts", q_t, k_c,
                           preferred_element_type=jnp.float32) * scale   # (nh, tq, tk) f32
            r_id = jax.lax.broadcasted_iota(jnp.int32, s.shape, 1) + row0
            c_id = jax.lax.broadcasted_iota(jnp.int32, s.shape, 2) + k0
            s = jnp.where(r_id >= c_id, s, -1e30)                         # finite causal mask
            m_prev = m_scr[...]
            m_new = jnp.maximum(m_prev, jnp.max(s, axis=-1, keepdims=True))
            alpha = jnp.exp(m_prev - m_new)
            p = jnp.exp(s - m_new)
            l_scr[...] = alpha * l_scr[...] + jnp.sum(p, axis=-1, keepdims=True)
            acc_scr[...] = alpha * acc_scr[...] + jnp.einsum(
                "hts,hsd->htd", p.astype(bf16), v_c, preferred_element_type=jnp.float32)
            m_scr[...] = m_new

    inv_l = pl.reciprocal(l_scr[...], approx=True) if approx_recip else 1.0 / l_scr[...]
    o_h = (acc_scr[...] * inv_l).astype(bf16)                             # (nh, tq, hd)

    # head-concat into a lane-dense (tq, C) buffer -> single K=C output projection matmul
    for hh in range(n_head):
        ocat_scr[:, hh * hd:(hh + 1) * hd] = o_h[hh]
    y = jnp.dot(ocat_scr[...], proj_w_ref[...],
                preferred_element_type=jnp.float32) + proj_b_ref[0]
    x2 = x_tile + y                                                       # residual 1

    # ---------- MLP, chunked over the 4C hidden dim ----------
    h2 = _layernorm(x2, ln2_w_ref[0], ln2_b_ref[0]).astype(bf16)
    H4 = fc_w_ref.shape[1]
    cs = _pick_mlp_chunk(H4)
    acc = jnp.zeros((tq, C), jnp.float32)
    for ci in range(H4 // cs):
        lo = ci * cs
        a = jnp.dot(h2, fc_w_ref[:, lo:lo + cs],
                    preferred_element_type=jnp.float32) + fc_b_ref[0, lo:lo + cs]
        g = _gelu_tanh(a).astype(bf16)
        acc = acc + jnp.dot(g, mlp_proj_w_ref[lo:lo + cs, :],
                            preferred_element_type=jnp.float32)
    o_ref[0] = (x2 + acc + mlp_proj_b_ref[0]).astype(o_ref.dtype)         # residual 2


def prepare_block_weights(params):
    """Cast matmul weights to bf16 once (hoisted out of the per-step call)."""
    bf16, f32 = jnp.bfloat16, jnp.float32
    return [
        params["ln1_w"].astype(f32), params["ln1_b"].astype(f32),
        params["attn_w"].astype(bf16), params["attn_b"].astype(f32),
        params["proj_w"].astype(bf16), params["proj_b"].astype(f32),
        params["ln2_w"].astype(f32), params["ln2_b"].astype(f32),
        params["fc_w"].astype(bf16), params["fc_b"].astype(f32),
        params["mlp_proj_w"].astype(bf16), params["mlp_proj_b"].astype(f32),
    ]


def gpt_block(x, weights, n_head, q_tile=None, approx_recip=True):
    B, T, C = x.shape
    assert C % n_head == 0
    hd = C // n_head
    bf16 = jnp.bfloat16

    vmem_cap = _vmem_capacity_bytes()
    tq = q_tile if q_tile is not None else _pick_q_tile(T, C, n_head, vmem_cap)
    assert T % tq == 0 and (tq == T or tq % 16 == 0), \
        "query tile must divide T and be a multiple of 16 (bf16 scratch slicing)"
    nq = T // tq
    tk = _pick_chunk(T)       # KV chunk for flash-style attention
    t_ln = _pick_chunk(T)     # row chunk for the LN1+QKV pass

    # generation-aware VMEM request: headroom below 64 MiB (v7x) / 128 MiB (v5e/v6e)
    vmem_limit = max(32 << 20,
                     min(_vmem_estimate_bytes(weights, T, C, tq, tk, t_ln, n_head),
                         int(vmem_cap * 0.82)))

    x_spec = pl.BlockSpec((1, T, C), lambda b, q: (b, 0, 0))    # full sequence, resident over q
    out_spec = pl.BlockSpec((1, tq, C), lambda b, q: (b, q, 0))
    scratch = [
        pltpu.VMEM((n_head, T, hd), bf16),           # Q
        pltpu.VMEM((n_head, T, hd), bf16),           # K
        pltpu.VMEM((n_head, T, hd), bf16),           # V
        pltpu.VMEM((n_head, tq, 1), jnp.float32),    # running max
        pltpu.VMEM((n_head, tq, 1), jnp.float32),    # running denom
        pltpu.VMEM((n_head, tq, hd), jnp.float32),   # running numerator
        pltpu.VMEM((tq, C), bf16),                   # head-concat output
    ]
    kern = functools.partial(block_kernel, n_head, t_ln, tk, approx_recip)

    def build(resident_weights):
        if resident_weights:
            # grid-invariant weights: one VMEM-resident copy, no pipelining / double-buffering
            w_specs = [pl.BlockSpec(memory_space=pltpu.MemorySpace.VMEM) for _ in weights]
        else:
            w_specs = [pl.BlockSpec(w.shape, lambda b, q, n=w.ndim: (0,) * n) for w in weights]
        return pl.pallas_call(
            kern,
            out_shape=jax.ShapeDtypeStruct((B, T, C), x.dtype),
            grid=(B, nq),
            in_specs=[x_spec] + w_specs,
            out_specs=out_spec,
            scratch_shapes=scratch,
            compiler_params=pltpu.CompilerParams(
                dimension_semantics=("parallel", "arbitrary"),
                vmem_limit_bytes=int(vmem_limit),
            ),
        )

    try:
        return build(True)(x, *weights)
    except (TypeError, ValueError, NotImplementedError, pltpu.LoweringException):
        # Narrow fallback: only if un-blocked VMEM-resident input specs are rejected by this
        # JAX version. Resource / runtime errors (e.g. VMEM OOM) propagate unchanged.
        return build(False)(x, *weights)


def reference_block(x, params, n_head):
    """Plain-JAX f32 reference for verification."""
    B, T, C = x.shape
    hd = C // n_head
    h = _layernorm(x, params["ln1_w"][0], params["ln1_b"][0])
    qkv = h @ params["attn_w"] + params["attn_b"][0]
    q, k, v = jnp.split(qkv, 3, axis=-1)
    q = q.reshape(B, T, n_head, hd).transpose(0, 2, 1, 3)
    k = k.reshape(B, T, n_head, hd).transpose(0, 2, 1, 3)
    v = v.reshape(B, T, n_head, hd).transpose(0, 2, 1, 3)
    s = jnp.einsum("bhqd,bhkd->bhqk", q, k) / math.sqrt(hd)
    mask = jnp.tril(jnp.ones((T, T), dtype=bool))
    s = jnp.where(mask, s, -jnp.inf)
    p = jax.nn.softmax(s, axis=-1)
    y = jnp.einsum("bhqk,bhkd->bhqd", p, v)
    y = y.transpose(0, 2, 1, 3).reshape(B, T, C)
    y = y @ params["proj_w"] + params["proj_b"][0]
    x = x + y
    h2 = _layernorm(x, params["ln2_w"][0], params["ln2_b"][0])
    h2 = h2 @ params["fc_w"] + params["fc_b"][0]
    h2 = _gelu_tanh(h2)
    h2 = h2 @ params["mlp_proj_w"] + params["mlp_proj_b"][0]
    return x + h2


def init_params(key, n_embd):
    ks = jax.random.split(key, 6)
    std = 0.02
    return {
        "ln1_w": jnp.ones((1, n_embd), jnp.float32),
        "ln1_b": jnp.zeros((1, n_embd), jnp.float32),
        "attn_w": std * jax.random.normal(ks[0], (n_embd, 3 * n_embd), jnp.float32),
        "attn_b": std * jax.random.normal(ks[1], (1, 3 * n_embd), jnp.float32),
        "proj_w": std * jax.random.normal(ks[2], (n_embd, n_embd), jnp.float32),
        "proj_b": jnp.zeros((1, n_embd), jnp.float32),
        "ln2_w": jnp.ones((1, n_embd), jnp.float32),
        "ln2_b": jnp.zeros((1, n_embd), jnp.float32),
        "fc_w": std * jax.random.normal(ks[3], (n_embd, 4 * n_embd), jnp.float32),
        "fc_b": std * jax.random.normal(ks[4], (1, 4 * n_embd), jnp.float32),
        "mlp_proj_w": std * jax.random.normal(ks[5], (4 * n_embd, n_embd), jnp.float32),
        "mlp_proj_b": jnp.zeros((1, n_embd), jnp.float32),
    }


if __name__ == "__main__":
    key = jax.random.PRNGKey(0)

    # (B, T, C, n_head, q_tile):
    #   1) single tile / single KV chunk everywhere
    #   2) two query tiles
    #   3) multi q-tile, multi KV-chunk (exercises causal-skip) and chunked LN1+QKV pass
    configs = [
        (2, 8, 32, 4, None),
        (2, 32, 64, 4, 16),
        (1, 512, 128, 4, 128),
    ]
    for (B, T, C, n_head, q_tile) in configs:
        kx, kp, key = jax.random.split(key, 3)
        x = jax.random.normal(kx, (B, T, C), jnp.float32)
        params = init_params(kp, C)
        weights = prepare_block_weights(params)   # bf16 casts done once, outside the call

        out = jax.block_until_ready(gpt_block(x, weights, n_head, q_tile=q_tile))
        ref = reference_block(x, params, n_head)

        assert out.shape == (B, T, C)
        max_err = float(jnp.max(jnp.abs(out - ref)))
        # bf16 matmul operands + approx reciprocal -> bf16-appropriate tolerance
        assert jnp.allclose(out, ref, rtol=2e-2, atol=2e-2), (B, T, C, max_err)

    print("KERNEL_OK")
</pallas_src>

<mosaic_0001>
module attributes {stable_mosaic.version = 11 : i64} {
  func.func @block_kernel(%arg0: i32, %arg1: i32, %arg2: memref<1x8x32xf32, #tpu.memory_space<vmem>>, %arg3: memref<1x32xf32, #tpu.memory_space<vmem>>, %arg4: memref<1x32xf32, #tpu.memory_space<vmem>>, %arg5: memref<32x96xbf16, #tpu.memory_space<vmem>>, %arg6: memref<1x96xf32, #tpu.memory_space<vmem>>, %arg7: memref<32x32xbf16, #tpu.memory_space<vmem>>, %arg8: memref<1x32xf32, #tpu.memory_space<vmem>>, %arg9: memref<1x32xf32, #tpu.memory_space<vmem>>, %arg10: memref<1x32xf32, #tpu.memory_space<vmem>>, %arg11: memref<32x128xbf16, #tpu.memory_space<vmem>>, %arg12: memref<1x128xf32, #tpu.memory_space<vmem>>, %arg13: memref<128x32xbf16, #tpu.memory_space<vmem>>, %arg14: memref<1x32xf32, #tpu.memory_space<vmem>>, %arg15: memref<1x8x32xf32, #tpu.memory_space<vmem>>, %arg16: memref<4x8x8xbf16, #tpu.memory_space<vmem>>, %arg17: memref<4x8x8xbf16, #tpu.memory_space<vmem>>, %arg18: memref<4x8x8xbf16, #tpu.memory_space<vmem>>, %arg19: memref<4x8x1xf32, #tpu.memory_space<vmem>>, %arg20: memref<4x8x1xf32, #tpu.memory_space<vmem>>, %arg21: memref<4x8x8xf32, #tpu.memory_space<vmem>>, %arg22: memref<8x32xbf16, #tpu.memory_space<vmem>>) attributes {dimension_semantics = [#tpu.dimension_semantics<parallel>, #tpu.dimension_semantics<arbitrary>], iteration_bounds = array<i64: 2, 1>, scalar_prefetch = 0 : i64, scratch_operands = 7 : i64, tpu.core_type = #tpu.core_type<tc>, window_params = [{transform_indices = @transform_0, window_bounds = array<i64: 1, 8, 32>}, {pipeline_mode = #tpu.pipeline_mode<synchronous>, transform_indices = @transform_1, window_bounds = array<i64: 1, 32>}, {pipeline_mode = #tpu.pipeline_mode<synchronous>, transform_indices = @transform_2, window_bounds = array<i64: 1, 32>}, {pipeline_mode = #tpu.pipeline_mode<synchronous>, transform_indices = @transform_3, window_bounds = array<i64: 32, 96>}, {pipeline_mode = #tpu.pipeline_mode<synchronous>, transform_indices = @transform_4, window_bounds = array<i64: 1, 96>}, {pipeline_mode = #tpu.pipeline_mode<synchronous>, transform_indices = @transform_5, window_bounds = array<i64: 32, 32>}, {pipeline_mode = #tpu.pipeline_mode<synchronous>, transform_indices = @transform_6, window_bounds = array<i64: 1, 32>}, {pipeline_mode = #tpu.pipeline_mode<synchronous>, transform_indices = @transform_7, window_bounds = array<i64: 1, 32>}, {pipeline_mode = #tpu.pipeline_mode<synchronous>, transform_indices = @transform_8, window_bounds = array<i64: 1, 32>}, {pipeline_mode = #tpu.pipeline_mode<synchronous>, transform_indices = @transform_9, window_bounds = array<i64: 32, 128>}, {pipeline_mode = #tpu.pipeline_mode<synchronous>, transform_indices = @transform_10, window_bounds = array<i64: 1, 128>}, {pipeline_mode = #tpu.pipeline_mode<synchronous>, transform_indices = @transform_11, window_bounds = array<i64: 128, 32>}, {pipeline_mode = #tpu.pipeline_mode<synchronous>, transform_indices = @transform_12, window_bounds = array<i64: 1, 32>}, {transform_indices = @transform_13, window_bounds = array<i64: 1, 8, 32>}]} {
    %c0_i32 = arith.constant 0 : i32
    %0 = arith.cmpi eq, %arg1, %c0_i32 : i32
    %1 = arith.extui %0 : i1 to i32
    %c0_i32_0 = arith.constant 0 : i32
    %2 = arith.cmpi ne, %1, %c0_i32_0 : i32
    scf.if %2 {
      %c0_65 = arith.constant 0 : index
      %c0_66 = arith.constant 0 : index
      %c0_67 = arith.constant 0 : index
      %108 = vector.load %arg2[%c0_65, %c0_66, %c0_67] : memref<1x8x32xf32, #tpu.memory_space<vmem>>, vector<1x8x32xf32>
      %109 = vector.shape_cast %108 : vector<1x8x32xf32> to vector<8x32xf32>
      %c0_68 = arith.constant 0 : index
      %c0_69 = arith.constant 0 : index
      %110 = vector.load %arg3[%c0_68, %c0_69] : memref<1x32xf32, #tpu.memory_space<vmem>>, vector<1x32xf32>
      %111 = vector.shape_cast %110 : vector<1x32xf32> to vector<32xf32>
      %c0_70 = arith.constant 0 : index
      %c0_71 = arith.constant 0 : index
      %112 = vector.load %arg4[%c0_70, %c0_71] : memref<1x32xf32, #tpu.memory_space<vmem>>, vector<1x32xf32>
      %113 = vector.shape_cast %112 : vector<1x32xf32> to vector<32xf32>
      %cst_72 = arith.constant dense<0.000000e+00> : vector<8xf32>
      %114 = vector.multi_reduction <add>, %109, %cst_72 [1] : vector<8x32xf32> to vector<8xf32>
      %115 = vector.shape_cast %114 : vector<8xf32> to vector<8x1xf32>
      %cst_73 = arith.constant 3.200000e+01 : f32
      %116 = vector.broadcast %cst_73 : f32 to vector<8x1xf32>
      %117 = arith.divf %115, %116 : vector<8x1xf32>
      %118 = vector.broadcast %117 : vector<8x1xf32> to vector<8x32xf32>
      %119 = arith.subf %109, %118 : vector<8x32xf32>
      %120 = arith.mulf %119, %119 : vector<8x32xf32>
      %cst_74 = arith.constant dense<0.000000e+00> : vector<8xf32>
      %121 = vector.multi_reduction <add>, %120, %cst_74 [1] : vector<8x32xf32> to vector<8xf32>
      %122 = vector.shape_cast %121 : vector<8xf32> to vector<8x1xf32>
      %cst_75 = arith.constant 3.200000e+01 : f32
      %123 = vector.broadcast %cst_75 : f32 to vector<8x1xf32>
      %124 = arith.divf %122, %123 : vector<8x1xf32>
      %125 = vector.broadcast %117 : vector<8x1xf32> to vector<8x32xf32>
      %126 = arith.subf %109, %125 : vector<8x32xf32>
      %cst_76 = arith.constant 9.99999974E-6 : f32
      %127 = vector.broadcast %cst_76 : f32 to vector<8x1xf32>
      %128 = arith.addf %124, %127 : vector<8x1xf32>
      %129 = math.rsqrt %128 : vector<8x1xf32>
      %130 = vector.broadcast %129 : vector<8x1xf32> to vector<8x32xf32>
      %131 = arith.mulf %126, %130 : vector<8x32xf32>
      %132 = vector.shape_cast %111 : vector<32xf32> to vector<1x32xf32>
      %133 = vector.broadcast %132 : vector<1x32xf32> to vector<8x32xf32>
      %134 = arith.mulf %131, %133 : vector<8x32xf32>
      %135 = vector.shape_cast %113 : vector<32xf32> to vector<1x32xf32>
      %136 = vector.broadcast %135 : vector<1x32xf32> to vector<8x32xf32>
      %137 = arith.addf %134, %136 : vector<8x32xf32>
      %138 = arith.truncf %137 : vector<8x32xf32> to vector<8x32xbf16>
      %c0_77 = arith.constant 0 : index
      %c0_78 = arith.constant 0 : index
      %139 = vector.load %arg5[%c0_77, %c0_78] : memref<32x96xbf16, #tpu.memory_space<vmem>>, vector<32x96xbf16>
      %cst_79 = arith.constant dense<0.000000e+00> : vector<8x96xf32>
      %140 = tpu.matmul %138, %139, %cst_79 {dimension_numbers = #tpu.dot_dimension_numbers<[1], [0], [0], [1], [0, 0, 1, 1], [], []>} : vector<8x32xbf16>, vector<32x96xbf16>, vector<8x96xf32> -> vector<8x96xf32>
      %c0_80 = arith.constant 0 : index
      %c0_81 = arith.constant 0 : index
      %141 = vector.load %arg6[%c0_80, %c0_81] : memref<1x96xf32, #tpu.memory_space<vmem>>, vector<1x96xf32>
      %142 = vector.shape_cast %141 : vector<1x96xf32> to vector<96xf32>
      %143 = vector.shape_cast %142 : vector<96xf32> to vector<1x96xf32>
      %144 = vector.broadcast %143 : vector<1x96xf32> to vector<8x96xf32>
      %145 = arith.addf %140, %144 : vector<8x96xf32>
      %146 = arith.truncf %145 : vector<8x96xf32> to vector<8x96xbf16>
      %147 = vector.extract_strided_slice %146 {offsets = [0, 0], sizes = [8, 8], strides = [1, 1]} : vector<8x96xbf16> to vector<8x8xbf16>
      %c0_82 = arith.constant 0 : index
      %c0_83 = arith.constant 0 : index
      %c0_84 = arith.constant 0 : index
      %148 = vector.load %arg16[%c0_82, %c0_83, %c0_84] : memref<4x8x8xbf16, #tpu.memory_space<vmem>>, vector<1x8x8xbf16>
      %149 = vector.shape_cast %148 : vector<1x8x8xbf16> to vector<8x8xbf16>
      %150 = vector.shape_cast %147 : vector<8x8xbf16> to vector<1x8x8xbf16>
      tpu.vector_store %arg16[%c0_82, %c0_83, %c0_84], %150 {strides = array<i32>} : memref<4x8x8xbf16, #tpu.memory_space<vmem>>, vector<1x8x8xbf16>,
      %151 = vector.extract_strided_slice %146 {offsets = [0, 32], sizes = [8, 8], strides = [1, 1]} : vector<8x96xbf16> to vector<8x8xbf16>
      %c0_85 = arith.constant 0 : index
      %c0_86 = arith.constant 0 : index
      %c0_87 = arith.constant 0 : index
      %152 = vector.load %arg17[%c0_85, %c0_86, %c0_87] : memref<4x8x8xbf16, #tpu.memory_space<vmem>>, vector<1x8x8xbf16>
      %153 = vector.shape_cast %152 : vector<1x8x8xbf16> to vector<8x8xbf16>
      %154 = vector.shape_cast %151 : vector<8x8xbf16> to vector<1x8x8xbf16>
      tpu.vector_store %arg17[%c0_85, %c0_86, %c0_87], %154 {strides = array<i32>} : memref<4x8x8xbf16, #tpu.memory_space<vmem>>, vector<1x8x8xbf16>,
      %155 = vector.extract_strided_slice %146 {offsets = [0, 64], sizes = [8, 8], strides = [1, 1]} : vector<8x96xbf16> to vector<8x8xbf16>
      %c0_88 = arith.constant 0 : index
      %c0_89 = arith.constant 0 : index
      %c0_90 = arith.constant 0 : index
      %156 = vector.load %arg18[%c0_88, %c0_89, %c0_90] : memref<4x8x8xbf16, #tpu.memory_space<vmem>>, vector<1x8x8xbf16>
      %157 = vector.shape_cast %156 : vector<1x8x8xbf16> to vector<8x8xbf16>
      %158 = vector.shape_cast %155 : vector<8x8xbf16> to vector<1x8x8xbf16>
      tpu.vector_store %arg18[%c0_88, %c0_89, %c0_90], %158 {strides = array<i32>} : memref<4x8x8xbf16, #tpu.memory_space<vmem>>, vector<1x8x8xbf16>,
      %159 = vector.extract_strided_slice %146 {offsets = [0, 8], sizes = [8, 8], strides = [1, 1]} : vector<8x96xbf16> to vector<8x8xbf16>
      %c1 = arith.constant 1 : index
      %c0_91 = arith.constant 0 : index
      %c0_92 = arith.constant 0 : index
      %160 = vector.load %arg16[%c1, %c0_91, %c0_92] : memref<4x8x8xbf16, #tpu.memory_space<vmem>>, vector<1x8x8xbf16>
      %161 = vector.shape_cast %160 : vector<1x8x8xbf16> to vector<8x8xbf16>
      %162 = vector.shape_cast %159 : vector<8x8xbf16> to vector<1x8x8xbf16>
      tpu.vector_store %arg16[%c1, %c0_91, %c0_92], %162 {strides = array<i32>} : memref<4x8x8xbf16, #tpu.memory_space<vmem>>, vector<1x8x8xbf16>,
      %163 = vector.extract_strided_slice %146 {offsets = [0, 40], sizes = [8, 8], strides = [1, 1]} : vector<8x96xbf16> to vector<8x8xbf16>
      %c1_93 = arith.constant 1 : index
      %c0_94 = arith.constant 0 : index
      %c0_95 = arith.constant 0 : index
      %164 = vector.load %arg17[%c1_93, %c0_94, %c0_95] : memref<4x8x8xbf16, #tpu.memory_space<vmem>>, vector<1x8x8xbf16>
      %165 = vector.shape_cast %164 : vector<1x8x8xbf16> to vector<8x8xbf16>
      %166 = vector.shape_cast %163 : vector<8x8xbf16> to vector<1x8x8xbf16>
      tpu.vector_store %arg17[%c1_93, %c0_94, %c0_95], %166 {strides = array<i32>} : memref<4x8x8xbf16, #tpu.memory_space<vmem>>, vector<1x8x8xbf16>,
      %167 = vector.extract_strided_slice %146 {offsets = [0, 72], sizes = [8, 8], strides = [1, 1]} : vector<8x96xbf16> to vector<8x8xbf16>
      %c1_96 = arith.constant 1 : index
      %c0_97 = arith.constant 0 : index
      %c0_98 = arith.constant 0 : index
      %168 = vector.load %arg18[%c1_96, %c0_97, %c0_98] : memref<4x8x8xbf16, #tpu.memory_space<vmem>>, vector<1x8x8xbf16>
      %169 = vector.shape_cast %168 : vector<1x8x8xbf16> to vector<8x8xbf16>
      %170 = vector.shape_cast %167 : vector<8x8xbf16> to vector<1x8x8xbf16>
      tpu.vector_store %arg18[%c1_96, %c0_97, %c0_98], %170 {strides = array<i32>} : memref<4x8x8xbf16, #tpu.memory_space<vmem>>, vector<1x8x8xbf16>,
      %171 = vector.extract_strided_slice %146 {offsets = [0, 16], sizes = [8, 8], strides = [1, 1]} : vector<8x96xbf16> to vector<8x8xbf16>
      %c2 = arith.constant 2 : index
      %c0_99 = arith.constant 0 : index
      %c0_100 = arith.constant 0 : index
      %172 = vector.load %arg16[%c2, %c0_99, %c0_100] : memref<4x8x8xbf16, #tpu.memory_space<vmem>>, vector<1x8x8xbf16>
      %173 = vector.shape_cast %172 : vector<1x8x8xbf16> to vector<8x8xbf16>
      %174 = vector.shape_cast %171 : vector<8x8xbf16> to vector<1x8x8xbf16>
      tpu.vector_store %arg16[%c2, %c0_99, %c0_100], %174 {strides = array<i32>} : memref<4x8x8xbf16, #tpu.memory_space<vmem>>, vector<1x8x8xbf16>,
      %175 = vector.extract_strided_slice %146 {offsets = [0, 48], sizes = [8, 8], strides = [1, 1]} : vector<8x96xbf16> to vector<8x8xbf16>
      %c2_101 = arith.constant 2 : index
      %c0_102 = arith.constant 0 : index
      %c0_103 = arith.constant 0 : index
      %176 = vector.load %arg17[%c2_101, %c0_102, %c0_103] : memref<4x8x8xbf16, #tpu.memory_space<vmem>>, vector<1x8x8xbf16>
      %177 = vector.shape_cast %176 : vector<1x8x8xbf16> to vector<8x8xbf16>
      %178 = vector.shape_cast %175 : vector<8x8xbf16> to vector<1x8x8xbf16>
      tpu.vector_store %arg17[%c2_101, %c0_102, %c0_103], %178 {strides = array<i32>} : memref<4x8x8xbf16, #tpu.memory_space<vmem>>, vector<1x8x8xbf16>,
      %179 = vector.extract_strided_slice %146 {offsets = [0, 80], sizes = [8, 8], strides = [1, 1]} : vector<8x96xbf16> to vector<8x8xbf16>
      %c2_104 = arith.constant 2 : index
      %c0_105 = arith.constant 0 : index
      %c0_106 = arith.constant 0 : index
      %180 = vector.load %arg18[%c2_104, %c0_105, %c0_106] : memref<4x8x8xbf16, #tpu.memory_space<vmem>>, vector<1x8x8xbf16>
      %181 = vector.shape_cast %180 : vector<1x8x8xbf16> to vector<8x8xbf16>
      %182 = vector.shape_cast %179 : vector<8x8xbf16> to vector<1x8x8xbf16>
      tpu.vector_store %arg18[%c2_104, %c0_105, %c0_106], %182 {strides = array<i32>} : memref<4x8x8xbf16, #tpu.memory_space<vmem>>, vector<1x8x8xbf16>,
      %183 = vector.extract_strided_slice %146 {offsets = [0, 24], sizes = [8, 8], strides = [1, 1]} : vector<8x96xbf16> to vector<8x8xbf16>
      %c3 = arith.constant 3 : index
      %c0_107 = arith.constant 0 : index
      %c0_108 = arith.constant 0 : index
      %184 = vector.load %arg16[%c3, %c0_107, %c0_108] : memref<4x8x8xbf16, #tpu.memory_space<vmem>>, vector<1x8x8xbf16>
      %185 = vector.shape_cast %184 : vector<1x8x8xbf16> to vector<8x8xbf16>
      %186 = vector.shape_cast %183 : vector<8x8xbf16> to vector<1x8x8xbf16>
      tpu.vector_store %arg16[%c3, %c0_107, %c0_108], %186 {strides = array<i32>} : memref<4x8x8xbf16, #tpu.memory_space<vmem>>, vector<1x8x8xbf16>,
      %187 = vector.extract_strided_slice %146 {offsets = [0, 56], sizes = [8, 8], strides = [1, 1]} : vector<8x96xbf16> to vector<8x8xbf16>
      %c3_109 = arith.constant 3 : index
      %c0_110 = arith.constant 0 : index
      %c0_111 = arith.constant 0 : index
      %188 = vector.load %arg17[%c3_109, %c0_110, %c0_111] : memref<4x8x8xbf16, #tpu.memory_space<vmem>>, vector<1x8x8xbf16>
      %189 = vector.shape_cast %188 : vector<1x8x8xbf16> to vector<8x8xbf16>
      %190 = vector.shape_cast %187 : vector<8x8xbf16> to vector<1x8x8xbf16>
      tpu.vector_store %arg17[%c3_109, %c0_110, %c0_111], %190 {strides = array<i32>} : memref<4x8x8xbf16, #tpu.memory_space<vmem>>, vector<1x8x8xbf16>,
      %191 = vector.extract_strided_slice %146 {offsets = [0, 88], sizes = [8, 8], strides = [1, 1]} : vector<8x96xbf16> to vector<8x8xbf16>
      %c3_112 = arith.constant 3 : index
      %c0_113 = arith.constant 0 : index
      %c0_114 = arith.constant 0 : index
      %192 = vector.load %arg18[%c3_112, %c0_113, %c0_114] : memref<4x8x8xbf16, #tpu.memory_space<vmem>>, vector<1x8x8xbf16>
      %193 = vector.shape_cast %192 : vector<1x8x8xbf16> to vector<8x8xbf16>
      %194 = vector.shape_cast %191 : vector<8x8xbf16> to vector<1x8x8xbf16>
      tpu.vector_store %arg18[%c3_112, %c0_113, %c0_114], %194 {strides = array<i32>} : memref<4x8x8xbf16, #tpu.memory_space<vmem>>, vector<1x8x8xbf16>,
    } else {
    }
    %c8_i32 = arith.constant 8 : i32
    %3 = arith.muli %arg1, %c8_i32 : i32
    %4 = tpu.assume_multiple %3, 8 : i32
    %c0 = arith.constant 0 : index
    %c0_1 = arith.constant 0 : index
    %c0_2 = arith.constant 0 : index
    %5 = vector.load %arg16[%c0, %c0_1, %c0_2] : memref<4x8x8xbf16, #tpu.memory_space<vmem>>, vector<4x8x8xbf16>
    %c0_3 = arith.constant 0 : index
    %c0_4 = arith.constant 0 : index
    %c0_5 = arith.constant 0 : index
    %6 = vector.load %arg2[%c0_3, %c0_4, %c0_5] : memref<1x8x32xf32, #tpu.memory_space<vmem>>, vector<1x8x32xf32>
    %7 = vector.shape_cast %6 : vector<1x8x32xf32> to vector<8x32xf32>
    %cst = arith.constant -1.000000e+30 : f32
    %8 = vector.broadcast %cst : f32 to vector<4x8x1xf32>
    %c0_6 = arith.constant 0 : index
    %c0_7 = arith.constant 0 : index
    %c0_8 = arith.constant 0 : index
    %9 = vector.load %arg19[%c0_6, %c0_7, %c0_8] : memref<4x8x1xf32, #tpu.memory_space<vmem>>, vector<4x8x1xf32>
    tpu.vector_store %arg19[%c0_6, %c0_7, %c0_8], %8 {strides = array<i32>} : memref<4x8x1xf32, #tpu.memory_space<vmem>>, vector<4x8x1xf32>,
    %cst_9 = arith.constant 0.000000e+00 : f32
    %10 = vector.broadcast %cst_9 : f32 to vector<4x8x1xf32>
    %c0_10 = arith.constant 0 : index
    %c0_11 = arith.constant 0 : index
    %c0_12 = arith.constant 0 : index
    %11 = vector.load %arg20[%c0_10, %c0_11, %c0_12] : memref<4x8x1xf32, #tpu.memory_space<vmem>>, vector<4x8x1xf32>
    tpu.vector_store %arg20[%c0_10, %c0_11, %c0_12], %10 {strides = array<i32>} : memref<4x8x1xf32, #tpu.memory_space<vmem>>, vector<4x8x1xf32>,
    %cst_13 = arith.constant 0.000000e+00 : f32
    %12 = vector.broadcast %cst_13 : f32 to vector<4x8x8xf32>
    %c0_14 = arith.constant 0 : index
    %c0_15 = arith.constant 0 : index
    %c0_16 = arith.constant 0 : index
    %13 = vector.load %arg21[%c0_14, %c0_15, %c0_16] : memref<4x8x8xf32, #tpu.memory_space<vmem>>, vector<4x8x8xf32>
    tpu.vector_store %arg21[%c0_14, %c0_15, %c0_16], %12 {strides = array<i32>} : memref<4x8x8xf32, #tpu.memory_space<vmem>>, vector<4x8x8xf32>,
    %c8_i32_17 = arith.constant 8 : i32
    %14 = arith.addi %4, %c8_i32_17 : i32
    %c0_i32_18 = arith.constant 0 : i32
    %15 = arith.cmpi sgt, %14, %c0_i32_18 : i32
    %16 = arith.extui %15 : i1 to i32
    %c0_i32_19 = arith.constant 0 : i32
    %17 = arith.cmpi ne, %16, %c0_i32_19 : i32
    scf.if %17 {
      %c0_65 = arith.constant 0 : index
      %c0_66 = arith.constant 0 : index
      %c0_67 = arith.constant 0 : index
      %108 = vector.load %arg17[%c0_65, %c0_66, %c0_67] : memref<4x8x8xbf16, #tpu.memory_space<vmem>>, vector<4x8x8xbf16>
      %c0_68 = arith.constant 0 : index
      %c0_69 = arith.constant 0 : index
      %c0_70 = arith.constant 0 : index
      %109 = vector.load %arg18[%c0_68, %c0_69, %c0_70] : memref<4x8x8xbf16, #tpu.memory_space<vmem>>, vector<4x8x8xbf16>
      "tpu.trace_start"() <{level = 10 : i32, message = "htd,hsd->hts"}> : () -> ()
      %cst_71 = arith.constant dense<0.000000e+00> : vector<4x8x8xf32>
      %110 = tpu.matmul %5, %108, %cst_71 {dimension_numbers = #tpu.dot_dimension_numbers<[2], [2], [1], [1], [0, 0, 0, 1, 1, 1], [0], [0]>} : vector<4x8x8xbf16>, vector<4x8x8xbf16>, vector<4x8x8xf32> -> vector<4x8x8xf32>
      "tpu.trace_stop"() : () -> ()
      %cst_72 = arith.constant 0.353553385 : f32
      %111 = vector.broadcast %cst_72 : f32 to vector<4x8x8xf32>
      %112 = arith.mulf %110, %111 : vector<4x8x8xf32>
      %113 = tpu.iota {dimensions = array<i32: 1>} : vector<4x8x8xi32>
      %114 = vector.broadcast %4 : i32 to vector<4x8x8xi32>
      %115 = arith.addi %113, %114 : vector<4x8x8xi32>
      %116 = tpu.iota {dimensions = array<i32: 2>} : vector<4x8x8xi32>
      %c0_i32_73 = arith.constant 0 : i32
      %117 = vector.broadcast %c0_i32_73 : i32 to vector<4x8x8xi32>
      %118 = arith.addi %116, %117 : vector<4x8x8xi32>
      %119 = arith.cmpi sge, %115, %118 : vector<4x8x8xi32>
      %cst_74 = arith.constant -1.000000e+30 : f32
      %120 = vector.broadcast %cst_74 : f32 to vector<4x8x8xf32>
      %121 = arith.select %119, %112, %120 : vector<4x8x8xi1>, vector<4x8x8xf32>
      %c0_75 = arith.constant 0 : index
      %c0_76 = arith.constant 0 : index
      %c0_77 = arith.constant 0 : index
      %122 = vector.load %arg19[%c0_75, %c0_76, %c0_77] : memref<4x8x1xf32, #tpu.memory_space<vmem>>, vector<4x8x1xf32>
      %cst_78 = arith.constant dense<0xFF800000> : vector<4x8xf32>
      %123 = vector.multi_reduction <maximumf>, %121, %cst_78 [2] : vector<4x8x8xf32> to vector<4x8xf32>
      %124 = vector.shape_cast %123 : vector<4x8xf32> to vector<4x8x1xf32>
      %125 = arith.maximumf %122, %124 : vector<4x8x1xf32>
      %126 = arith.subf %122, %125 : vector<4x8x1xf32>
      %127 = math.exp %126 : vector<4x8x1xf32>
      %128 = vector.broadcast %125 : vector<4x8x1xf32> to vector<4x8x8xf32>
      %129 = arith.subf %121, %128 : vector<4x8x8xf32>
      %130 = math.exp %129 : vector<4x8x8xf32>
      %c0_79 = arith.constant 0 : index
      %c0_80 = arith.constant 0 : index
      %c0_81 = arith.constant 0 : index
      %131 = vector.load %arg20[%c0_79, %c0_80, %c0_81] : memref<4x8x1xf32, #tpu.memory_space<vmem>>, vector<4x8x1xf32>
      %132 = arith.mulf %127, %131 : vector<4x8x1xf32>
      %cst_82 = arith.constant dense<0.000000e+00> : vector<4x8xf32>
      %133 = vector.multi_reduction <add>, %130, %cst_82 [2] : vector<4x8x8xf32> to vector<4x8xf32>
      %134 = vector.shape_cast %133 : vector<4x8xf32> to vector<4x8x1xf32>
      %135 = arith.addf %132, %134 : vector<4x8x1xf32>
      %c0_83 = arith.constant 0 : index
      %c0_84 = arith.constant 0 : index
      %c0_85 = arith.constant 0 : index
      %136 = vector.load %arg20[%c0_83, %c0_84, %c0_85] : memref<4x8x1xf32, #tpu.memory_space<vmem>>, vector<4x8x1xf32>
      tpu.vector_store %arg20[%c0_83, %c0_84, %c0_85], %135 {strides = array<i32>} : memref<4x8x1xf32, #tpu.memory_space<vmem>>, vector<4x8x1xf32>,
      %c0_86 = arith.constant 0 : index
      %c0_87 = arith.constant 0 : index
      %c0_88 = arith.constant 0 : index
      %137 = vector.load %arg21[%c0_86, %c0_87, %c0_88] : memref<4x8x8xf32, #tpu.memory_space<vmem>>, vector<4x8x8xf32>
      %138 = vector.broadcast %127 : vector<4x8x1xf32> to vector<4x8x8xf32>
      %139 = arith.mulf %138, %137 : vector<4x8x8xf32>
      %140 = arith.truncf %130 : vector<4x8x8xf32> to vector<4x8x8xbf16>
      "tpu.trace_start"() <{level = 10 : i32, message = "hts,hsd->htd"}> : () -> ()
      %cst_89 = arith.constant dense<0.000000e+00> : vector<4x8x8xf32>
      %141 = tpu.matmul %140, %109, %cst_89 {dimension_numbers = #tpu.dot_dimension_numbers<[2], [1], [1], [2], [0, 0, 0, 1, 1, 2], [0], [0]>} : vector<4x8x8xbf16>, vector<4x8x8xbf16>, vector<4x8x8xf32> -> vector<4x8x8xf32>
      "tpu.trace_stop"() : () -> ()
      %142 = arith.addf %139, %141 : vector<4x8x8xf32>
      %c0_90 = arith.constant 0 : index
      %c0_91 = arith.constant 0 : index
      %c0_92 = arith.constant 0 : index
      %143 = vector.load %arg21[%c0_90, %c0_91, %c0_92] : memref<4x8x8xf32, #tpu.memory_space<vmem>>, vector<4x8x8xf32>
      tpu.vector_store %arg21[%c0_90, %c0_91, %c0_92], %142 {strides = array<i32>} : memref<4x8x8xf32, #tpu.memory_space<vmem>>, vector<4x8x8xf32>,
      %c0_93 = arith.constant 0 : index
      %c0_94 = arith.constant 0 : index
      %c0_95 = arith.constant 0 : index
      %144 = vector.load %arg19[%c0_93, %c0_94, %c0_95] : memref<4x8x1xf32, #tpu.memory_space<vmem>>, vector<4x8x1xf32>
      tpu.vector_store %arg19[%c0_93, %c0_94, %c0_95], %125 {strides = array<i32>} : memref<4x8x1xf32, #tpu.memory_space<vmem>>, vector<4x8x1xf32>,
    } else {
    }
    %c0_20 = arith.constant 0 : index
    %c0_21 = arith.constant 0 : index
    %c0_22 = arith.constant 0 : index
    %18 = vector.load %arg20[%c0_20, %c0_21, %c0_22] : memref<4x8x1xf32, #tpu.memory_space<vmem>>, vector<4x8x1xf32>
    %19 = tpu.reciprocal %18 {approx = true} : vector<4x8x1xf32> -> vector<4x8x1xf32>
    %c0_23 = arith.constant 0 : index
    %c0_24 = arith.constant 0 : index
    %c0_25 = arith.constant 0 : index
    %20 = vector.load %arg21[%c0_23, %c0_24, %c0_25] : memref<4x8x8xf32, #tpu.memory_space<vmem>>, vector<4x8x8xf32>
    %21 = vector.broadcast %19 : vector<4x8x1xf32> to vector<4x8x8xf32>
    %22 = arith.mulf %20, %21 : vector<4x8x8xf32>
    %23 = arith.truncf %22 : vector<4x8x8xf32> to vector<4x8x8xbf16>
    %24 = vector.extract_strided_slice %23 {offsets = [0, 0, 0], sizes = [1, 8, 8], strides = [1, 1, 1]} : vector<4x8x8xbf16> to vector<1x8x8xbf16>
    %25 = vector.shape_cast %24 : vector<1x8x8xbf16> to vector<8x8xbf16>
    %c0_26 = arith.constant 0 : index
    %c0_27 = arith.constant 0 : index
    %26 = vector.load %arg22[%c0_26, %c0_27] : memref<8x32xbf16, #tpu.memory_space<vmem>>, vector<8x8xbf16>
    tpu.vector_store %arg22[%c0_26, %c0_27], %25 {strides = array<i32>} : memref<8x32xbf16, #tpu.memory_space<vmem>>, vector<8x8xbf16>,
    %27 = vector.extract_strided_slice %23 {offsets = [1, 0, 0], sizes = [1, 8, 8], strides = [1, 1, 1]} : vector<4x8x8xbf16> to vector<1x8x8xbf16>
    %28 = vector.shape_cast %27 : vector<1x8x8xbf16> to vector<8x8xbf16>
    %c0_28 = arith.constant 0 : index
    %c8 = arith.constant 8 : index
    %29 = vector.load %arg22[%c0_28, %c8] : memref<8x32xbf16, #tpu.memory_space<vmem>>, vector<8x8xbf16>
    tpu.vector_store %arg22[%c0_28, %c8], %28 {strides = array<i32>} : memref<8x32xbf16, #tpu.memory_space<vmem>>, vector<8x8xbf16>,
    %30 = vector.extract_strided_slice %23 {offsets = [2, 0, 0], sizes = [1, 8, 8], strides = [1, 1, 1]} : vector<4x8x8xbf16> to vector<1x8x8xbf16>
    %31 = vector.shape_cast %30 : vector<1x8x8xbf16> to vector<8x8xbf16>
    %c0_29 = arith.constant 0 : index
    %c16 = arith.constant 16 : index
    %32 = vector.load %arg22[%c0_29, %c16] : memref<8x32xbf16, #tpu.memory_space<vmem>>, vector<8x8xbf16>
    tpu.vector_store %arg22[%c0_29, %c16], %31 {strides = array<i32>} : memref<8x32xbf16, #tpu.memory_space<vmem>>, vector<8x8xbf16>,
    %33 = vector.extract_strided_slice %23 {offsets = [3, 0, 0], sizes = [1, 8, 8], strides = [1, 1, 1]} : vector<4x8x8xbf16> to vector<1x8x8xbf16>
    %34 = vector.shape_cast %33 : vector<1x8x8xbf16> to vector<8x8xbf16>
    %c0_30 = arith.constant 0 : index
    %c24 = arith.constant 24 : index
    %35 = vector.load %arg22[%c0_30, %c24] : memref<8x32xbf16, #tpu.memory_space<vmem>>, vector<8x8xbf16>
    tpu.vector_store %arg22[%c0_30, %c24], %34 {strides = array<i32>} : memref<8x32xbf16, #tpu.memory_space<vmem>>, vector<8x8xbf16>,
    %c0_31 = arith.constant 0 : index
    %c0_32 = arith.constant 0 : index
    %36 = vector.load %arg22[%c0_31, %c0_32] : memref<8x32xbf16, #tpu.memory_space<vmem>>, vector<8x32xbf16>
    %c0_33 = arith.constant 0 : index
    %c0_34 = arith.constant 0 : index
    %37 = vector.load %arg7[%c0_33, %c0_34] : memref<32x32xbf16, #tpu.memory_space<vmem>>, vector<32x32xbf16>
    %cst_35 = arith.constant dense<0.000000e+00> : vector<8x32xf32>
    %38 = tpu.matmul %36, %37, %cst_35 {dimension_numbers = #tpu.dot_dimension_numbers<[1], [0], [0], [1], [0, 0, 1, 1], [], []>} : vector<8x32xbf16>, vector<32x32xbf16>, vector<8x32xf32> -> vector<8x32xf32>
    %c0_36 = arith.constant 0 : index
    %c0_37 = arith.constant 0 : index
    %39 = vector.load %arg8[%c0_36, %c0_37] : memref<1x32xf32, #tpu.memory_space<vmem>>, vector<1x32xf32>
    %40 = vector.shape_cast %39 : vector<1x32xf32> to vector<32xf32>
    %41 = vector.shape_cast %40 : vector<32xf32> to vector<1x32xf32>
    %42 = vector.broadcast %41 : vector<1x32xf32> to vector<8x32xf32>
    %43 = arith.addf %38, %42 : vector<8x32xf32>
    %44 = arith.addf %7, %43 : vector<8x32xf32>
    %c0_38 = arith.constant 0 : index
    %c0_39 = arith.constant 0 : index
    %45 = vector.load %arg9[%c0_38, %c0_39] : memref<1x32xf32, #tpu.memory_space<vmem>>, vector<1x32xf32>
    %46 = vector.shape_cast %45 : vector<1x32xf32> to vector<32xf32>
    %c0_40 = arith.constant 0 : index
    %c0_41 = arith.constant 0 : index
    %47 = vector.load %arg10[%c0_40, %c0_41] : memref<1x32xf32, #tpu.memory_space<vmem>>, vector<1x32xf32>
    %48 = vector.shape_cast %47 : vector<1x32xf32> to vector<32xf32>
    %cst_42 = arith.constant dense<0.000000e+00> : vector<8xf32>
    %49 = vector.multi_reduction <add>, %44, %cst_42 [1] : vector<8x32xf32> to vector<8xf32>
    %50 = vector.shape_cast %49 : vector<8xf32> to vector<8x1xf32>
    %cst_43 = arith.constant 3.200000e+01 : f32
    %51 = vector.broadcast %cst_43 : f32 to vector<8x1xf32>
    %52 = arith.divf %50, %51 : vector<8x1xf32>
    %53 = vector.broadcast %52 : vector<8x1xf32> to vector<8x32xf32>
    %54 = arith.subf %44, %53 : vector<8x32xf32>
    %55 = arith.mulf %54, %54 : vector<8x32xf32>
    %cst_44 = arith.constant dense<0.000000e+00> : vector<8xf32>
    %56 = vector.multi_reduction <add>, %55, %cst_44 [1] : vector<8x32xf32> to vector<8xf32>
    %57 = vector.shape_cast %56 : vector<8xf32> to vector<8x1xf32>
    %cst_45 = arith.constant 3.200000e+01 : f32
    %58 = vector.broadcast %cst_45 : f32 to vector<8x1xf32>
    %59 = arith.divf %57, %58 : vector<8x1xf32>
    %60 = vector.broadcast %52 : vector<8x1xf32> to vector<8x32xf32>
    %61 = arith.subf %44, %60 : vector<8x32xf32>
    %cst_46 = arith.constant 9.99999974E-6 : f32
    %62 = vector.broadcast %cst_46 : f32 to vector<8x1xf32>
    %63 = arith.addf %59, %62 : vector<8x1xf32>
    %64 = math.rsqrt %63 : vector<8x1xf32>
    %65 = vector.broadcast %64 : vector<8x1xf32> to vector<8x32xf32>
    %66 = arith.mulf %61, %65 : vector<8x32xf32>
    %67 = vector.shape_cast %46 : vector<32xf32> to vector<1x32xf32>
    %68 = vector.broadcast %67 : vector<1x32xf32> to vector<8x32xf32>
    %69 = arith.mulf %66, %68 : vector<8x32xf32>
    %70 = vector.shape_cast %48 : vector<32xf32> to vector<1x32xf32>
    %71 = vector.broadcast %70 : vector<1x32xf32> to vector<8x32xf32>
    %72 = arith.addf %69, %71 : vector<8x32xf32>
    %73 = arith.truncf %72 : vector<8x32xf32> to vector<8x32xbf16>
    %cst_47 = arith.constant 0.000000e+00 : f32
    %74 = vector.broadcast %cst_47 : f32 to vector<8x32xf32>
    %c0_48 = arith.constant 0 : index
    %c0_49 = arith.constant 0 : index
    %75 = vector.load %arg11[%c0_48, %c0_49] : memref<32x128xbf16, #tpu.memory_space<vmem>>, vector<32x128xbf16>
    %cst_50 = arith.constant dense<0.000000e+00> : vector<8x128xf32>
    %76 = tpu.matmul %73, %75, %cst_50 {dimension_numbers = #tpu.dot_dimension_numbers<[1], [0], [0], [1], [0, 0, 1, 1], [], []>} : vector<8x32xbf16>, vector<32x128xbf16>, vector<8x128xf32> -> vector<8x128xf32>
    %c0_51 = arith.constant 0 : index
    %c0_52 = arith.constant 0 : index
    %77 = vector.load %arg12[%c0_51, %c0_52] : memref<1x128xf32, #tpu.memory_space<vmem>>, vector<1x128xf32>
    %78 = vector.shape_cast %77 : vector<1x128xf32> to vector<128xf32>
    %79 = vector.shape_cast %78 : vector<128xf32> to vector<1x128xf32>
    %80 = vector.broadcast %79 : vector<1x128xf32> to vector<8x128xf32>
    %81 = arith.addf %76, %80 : vector<8x128xf32>
    %cst_53 = arith.constant 5.000000e-01 : f32
    %82 = vector.broadcast %cst_53 : f32 to vector<8x128xf32>
    %83 = arith.mulf %82, %81 : vector<8x128xf32>
    %cst_54 = arith.constant 4.471500e-02 : f32
    %84 = vector.broadcast %cst_54 : f32 to vector<8x128xf32>
    %85 = arith.mulf %84, %81 : vector<8x128xf32>
    %86 = arith.mulf %85, %81 : vector<8x128xf32>
    %87 = arith.mulf %86, %81 : vector<8x128xf32>
    %88 = arith.addf %81, %87 : vector<8x128xf32>
    %cst_55 = arith.constant 0.797884583 : f32
    %89 = vector.broadcast %cst_55 : f32 to vector<8x128xf32>
    %90 = arith.mulf %89, %88 : vector<8x128xf32>
    %91 = math.tanh %90 : vector<8x128xf32>
    %cst_56 = arith.constant 1.000000e+00 : f32
    %92 = vector.broadcast %cst_56 : f32 to vector<8x128xf32>
    %93 = arith.addf %92, %91 : vector<8x128xf32>
    %94 = arith.mulf %83, %93 : vector<8x128xf32>
    %95 = arith.truncf %94 : vector<8x128xf32> to vector<8x128xbf16>
    %c0_57 = arith.constant 0 : index
    %c0_58 = arith.constant 0 : index
    %96 = vector.load %arg13[%c0_57, %c0_58] : memref<128x32xbf16, #tpu.memory_space<vmem>>, vector<128x32xbf16>
    %cst_59 = arith.constant dense<0.000000e+00> : vector<8x32xf32>
    %97 = tpu.matmul %95, %96, %cst_59 {dimension_numbers = #tpu.dot_dimension_numbers<[1], [0], [0], [1], [0, 0, 1, 1], [], []>} : vector<8x128xbf16>, vector<128x32xbf16>, vector<8x32xf32> -> vector<8x32xf32>
    %98 = arith.addf %74, %97 : vector<8x32xf32>
    %99 = arith.addf %44, %98 : vector<8x32xf32>
    %c0_60 = arith.constant 0 : index
    %c0_61 = arith.constant 0 : index
    %100 = vector.load %arg14[%c0_60, %c0_61] : memref<1x32xf32, #tpu.memory_space<vmem>>, vector<1x32xf32>
    %101 = vector.shape_cast %100 : vector<1x32xf32> to vector<32xf32>
    %102 = vector.shape_cast %101 : vector<32xf32> to vector<1x32xf32>
    %103 = vector.broadcast %102 : vector<1x32xf32> to vector<8x32xf32>
    %104 = arith.addf %99, %103 : vector<8x32xf32>
    %c0_62 = arith.constant 0 : index
    %c0_63 = arith.constant 0 : index
    %c0_64 = arith.constant 0 : index
    %105 = vector.load %arg15[%c0_62, %c0_63, %c0_64] : memref<1x8x32xf32, #tpu.memory_space<vmem>>, vector<1x8x32xf32>
    %106 = vector.shape_cast %105 : vector<1x8x32xf32> to vector<8x32xf32>
    %107 = vector.shape_cast %104 : vector<8x32xf32> to vector<1x8x32xf32>
    tpu.vector_store %arg15[%c0_62, %c0_63, %c0_64], %107 {strides = array<i32>} : memref<1x8x32xf32, #tpu.memory_space<vmem>>, vector<1x8x32xf32>,
    return
  }
  func.func @transform_0(%arg0: i32, %arg1: i32) -> (i32, i32, i32) {
    %c0_i32 = arith.constant 0 : i32
    %c0_i32_0 = arith.constant 0 : i32
    %c0_i32_1 = arith.constant 0 : i32
    return %arg0, %c0_i32, %c0_i32_0 : i32, i32, i32
  }
  func.func @transform_1(%arg0: i32, %arg1: i32) -> (i32, i32) {
    %c0_i32 = arith.constant 0 : i32
    %c0_i32_0 = arith.constant 0 : i32
    %c0_i32_1 = arith.constant 0 : i32
    return %c0_i32, %c0_i32_0 : i32, i32
  }
  func.func @transform_2(%arg0: i32, %arg1: i32) -> (i32, i32) {
    %c0_i32 = arith.constant 0 : i32
    %c0_i32_0 = arith.constant 0 : i32
    %c0_i32_1 = arith.constant 0 : i32
    return %c0_i32, %c0_i32_0 : i32, i32
  }
  func.func @transform_3(%arg0: i32, %arg1: i32) -> (i32, i32) {
    %c0_i32 = arith.constant 0 : i32
    %c0_i32_0 = arith.constant 0 : i32
    %c0_i32_1 = arith.constant 0 : i32
    return %c0_i32, %c0_i32_0 : i32, i32
  }
  func.func @transform_4(%arg0: i32, %arg1: i32) -> (i32, i32) {
    %c0_i32 = arith.constant 0 : i32
    %c0_i32_0 = arith.constant 0 : i32
    %c0_i32_1 = arith.constant 0 : i32
    return %c0_i32, %c0_i32_0 : i32, i32
  }
  func.func @transform_5(%arg0: i32, %arg1: i32) -> (i32, i32) {
    %c0_i32 = arith.constant 0 : i32
    %c0_i32_0 = arith.constant 0 : i32
    %c0_i32_1 = arith.constant 0 : i32
    return %c0_i32, %c0_i32_0 : i32, i32
  }
  func.func @transform_6(%arg0: i32, %arg1: i32) -> (i32, i32) {
    %c0_i32 = arith.constant 0 : i32
    %c0_i32_0 = arith.constant 0 : i32
    %c0_i32_1 = arith.constant 0 : i32
    return %c0_i32, %c0_i32_0 : i32, i32
  }
  func.func @transform_7(%arg0: i32, %arg1: i32) -> (i32, i32) {
    %c0_i32 = arith.constant 0 : i32
    %c0_i32_0 = arith.constant 0 : i32
    %c0_i32_1 = arith.constant 0 : i32
    return %c0_i32, %c0_i32_0 : i32, i32
  }
  func.func @transform_8(%arg0: i32, %arg1: i32) -> (i32, i32) {
    %c0_i32 = arith.constant 0 : i32
    %c0_i32_0 = arith.constant 0 : i32
    %c0_i32_1 = arith.constant 0 : i32
    return %c0_i32, %c0_i32_0 : i32, i32
  }
  func.func @transform_9(%arg0: i32, %arg1: i32) -> (i32, i32) {
    %c0_i32 = arith.constant 0 : i32
    %c0_i32_0 = arith.constant 0 : i32
    %c0_i32_1 = arith.constant 0 : i32
    return %c0_i32, %c0_i32_0 : i32, i32
  }
  func.func @transform_10(%arg0: i32, %arg1: i32) -> (i32, i32) {
    %c0_i32 = arith.constant 0 : i32
    %c0_i32_0 = arith.constant 0 : i32
    %c0_i32_1 = arith.constant 0 : i32
    return %c0_i32, %c0_i32_0 : i32, i32
  }
  func.func @transform_11(%arg0: i32, %arg1: i32) -> (i32, i32) {
    %c0_i32 = arith.constant 0 : i32
    %c0_i32_0 = arith.constant 0 : i32
    %c0_i32_1 = arith.constant 0 : i32
    return %c0_i32, %c0_i32_0 : i32, i32
  }
  func.func @transform_12(%arg0: i32, %arg1: i32) -> (i32, i32) {
    %c0_i32 = arith.constant 0 : i32
    %c0_i32_0 = arith.constant 0 : i32
    %c0_i32_1 = arith.constant 0 : i32
    return %c0_i32, %c0_i32_0 : i32, i32
  }
  func.func @transform_13(%arg0: i32, %arg1: i32) -> (i32, i32, i32) {
    %c0_i32 = arith.constant 0 : i32
    %c0_i32_0 = arith.constant 0 : i32
    return %arg0, %arg1, %c0_i32 : i32, i32, i32
  }
}

</mosaic_0001>

<bundles_post_ra>
// kernel: tpu_custom_call.1
= control target key start
LH: loop header
LB: loop body
LE: loop exit
PB: predicated region body
PF: predicated region fallthrough
CT: control target
= control target key end

     0   :  { %s2429_s0 = inlined_call_operand.vmem [shape: f32[2,8,32], index: 0, kind: input, shape index: {}]   ;;  %s2430_s1 = inlined_call_operand.vmem [shape: f32[1,32], index: 1, kind: input, shape index: {}]   ;;  %s2431_s2 = inlined_call_operand.vmem [shape: f32[1,32], index: 2, kind: input, shape index: {}]   ;;  %s2432_s3 = inlined_call_operand.vmem [shape: bf16[32,96], index: 3, kind: input, shape index: {}]   ;;  %s2433_s4 = inlined_call_operand.vmem [shape: f32[1,96], index: 4, kind: input, shape index: {}]   ;;  %s2434_s5 = inlined_call_operand.vmem [shape: bf16[32,32], index: 5, kind: input, shape index: {}]   ;;  %s2435_s6 = inlined_call_operand.vmem [shape: f32[1,32], index: 6, kind: input, shape index: {}]   ;;  %s2436_s7 = inlined_call_operand.vmem [shape: f32[1,32], index: 7, kind: input, shape index: {}]   ;;  %s2437_s8 = inlined_call_operand.vmem [shape: f32[1,32], index: 8, kind: input, shape index: {}]   ;;  %s2438_s9 = inlined_call_operand.vmem [shape: bf16[32,128], index: 9, kind: input, shape index: {}]   ;;  %s2439_s10 = inlined_call_operand.vmem [shape: f32[1,128], index: 10, kind: input, shape index: {}]   ;;  %s2440_s11 = inlined_call_operand.vmem [shape: bf16[128,32], index: 11, kind: input, shape index: {}]   ;;  %s2441_s12 = inlined_call_operand.vmem [shape: f32[1,32], index: 12, kind: input, shape index: {}]   ;;  %s2442_s13 = inlined_call_operand.hbm [shape: f32[2,8,32], index: 13, kind: output, shape index: {}]  }
   0x1   :  { %2443 = sst [smem:[#allocation12_spill]] %s2429_s0 }
   0x2   :  { %2444 = sst [smem:[#allocation13_spill]] %s2430_s1 }
   0x3   :  { %2445 = sst [smem:[#allocation14_spill]] %s2431_s2 }
   0x4   :  { %2446 = sst [smem:[#allocation15_spill]] %s2432_s3 }
   0x5   :  { %18 = vsyncpa [#allocation10], 0 }
   0x6   :  { %20 = vsyncpa [#allocation10 + $0x1], 0  ;;  %s2069_s25 = smov 0   ;;  %s2071_s26 = smov 0  }
   0x7   :  { %s2073_s27 = smov 0   ;;  %s2075_s28 = smov 0  }
   0x8   :  { %s2077_s29 = smov 0   ;;  %s2079_s30 = smov 0  }
   0x9 LB: > { %s1605_s14 = sadd.s32 4294967295, %s1978_s30   ;;  %s1606_s15 = sadd.s32 4294967294, %s1978_s30   ;;  %s1978_s30 = sphi %s2079_s30, %s26_s30   ;;  %s1974_s29 = sphi %s2077_s29, %s2457_s29   ;;  %s1970_s28 = sphi %s2075_s28, %s2456_s28   ;;  %s1966_s27 = sphi %s2073_s27, %s2455_s27   ;;  %s1962_s26 = sphi %s2071_s26, %s2454_s26   ;;  %s1958_s25 = sphi %s2069_s25, %s2453_s25  }
   0xa   : > { %s38_s16 = sadd.s32 1, %s1974_s29  ;;  %s325_s17 = sadd.s32 1, %s1966_s27 }
   0xb   : > { %p40_p0 = scmp.ge.s32.totalorder %s38_s16, 2  ;;  %p335_p1 = scmp.ne.s32.totalorder %s1966_s27, %s1962_s26 }
   0xc   : > { %p336_p2 = scmp.eq.s32.totalorder %s1605_s14, 1  ;;  %p341_p3 = scmp.ne.s32.totalorder %s1962_s26, %s1958_s25 }
   0xd   : > { %s2459_s16 = smov (%p40_p0, %s38_s16), 0  ;;  %p342_p5 = scmp.eq.s32.totalorder %s1606_s15, 1 }
   0xe   : > { %p2109_p4 = por %p336_p2, %p335_p1  ;;  %s320_s19 = ssub.s32 %s1974_s29, %s2459_s16 }
   0xf   : > { %p1609_p6 = scmp.ge.s32.totalorder %s1978_s30, 1  ;;  %p323_p7 = scmp.eq.s32.totalorder %s320_s19, 0 }
  0x10   : > { %p2116_p8 = por %p342_p5, %p341_p3  ;;  %p403_p9 = scmp.lt.s32.totalorder %s1978_s30, 3 }
  0x11   : > { %s2122_s21 = scalar_select %p323_p7, %s1966_s27, %s325_s17  }
  0x12   : > { %p404_p10 = pnand %p1609_p6, %p403_p9 }
  0x13   : > { %p446_p11 = scmp.lt.s32.totalorder (!%p404_p10), %s1970_s28, 1  ;;  %s2449_s0 = sld [smem:[#allocation12_spill]] (!%p404_p10) }
  0x14   : > { %407 = sbr.rel (%p404_p10) target bundleno = 2520 (0x9d8), region = 72  ;;  %s2450_s3 = sld [smem:[#allocation15_spill]] (!%p404_p10) }
  0x15   : > { %s2451_s1 = sld [smem:[#allocation13_spill]] (!%p404_p10)  ;;  %s1983_s24 = smov (!%p404_p10), 96  }
  0x16   : > { %s2452_s2 = sld [smem:[#allocation14_spill]] (!%p404_p10)  ;;  %s1984_s14 = smov (!%p404_p10), 88  }
  0x17   : > { %s1986_s17 = smov (!%p404_p10), 72   ;;  %s1987_s19 = smov (!%p404_p10), 112  }
  0x19   : > { %s447_s22 = scalar_select %p446_p11, %s1970_s28, 1  ;;  %vm458_vm0 = vcmask 261120   ;;  %v1980_v8 = vmov 0.0   ;;  %vm1981_vm1 = vmmov 0   ;;  %v1614_v20 = vld [vmem:[%s2433_s4] ss:$0 sm:$0xff]  ;;  %v834_v47 = vlaneseq }
  0x1a   : > { %v1858_v7 = vld [vmem:[%s2450_s3 + $0x8] sm:$0xff]   ;;  %1691 = vmatprep.subr.bf16.mxu0 %v1980_v8  ;;  %1695 = vmatprep.mubr.msk.bf16.mxu0 %vm1981_vm1, %v1980_v8  ;;  %v1859_v9 = vld [vmem:[%s2450_s3] sm:$0xff]   ;;  %vm628_vm2 = vcmask 64512   ;;  %vm555_vm3 = vcmask 60416   ;;  %vm619_vm4 = vcmask 7168   ;;  %vm972_vm6 = vcmask 1043456  }
  0x1b   : > { %s1611_s23 = sshll.u32 %s447_s22, 3  ;;  %1692 = vmatpush3.bf16.msra.mxu0 %v1858_v7  ;;  %1711 = vmatprep.subr.bf16.mxu1 %v1980_v8  ;;  %v1612_v14 = vld [vmem:[%s2451_s1] ss:$0 sm:$0xff]  ;;  %629 = vst.msk [vmem:[#allocation7] sm:$0xff] %vm628_vm2, %v1980_v8  ;;  %630 = vst.msk [vmem:[#allocation7 + $0x8] sm:$0xff] %vm628_vm2, %v1980_v8  ;;  %s1988_s22 = smov 104  }
  0x1c   : > { %s449_s15 = scalar_lea.vmem %s2449_s0, %s1611_s23  ;;  %1693 = vmatprep.subr.bf16.mxu0 %v1980_v8  ;;  %1713 = vmatprep.mubr.msk.bf16.mxu1 %vm1981_vm1, %v1980_v8  ;;  %v1613_v16 = vld [vmem:[%s2452_s2] ss:$0 sm:$0xff]  ;;  %631 = vst.msk [vmem:[#allocation7 + $0x10] sm:$0xff] %vm628_vm2, %v1980_v8  ;;  %632 = vst.msk [vmem:[#allocation7 + $0x18] sm:$0xff] %vm628_vm2, %v1980_v8  ;;  %s1982_s23 = smov 80   ;;  %v835_v48 = vshrl.u32 %v834_v47, 7 }
  0x1d   : > { %v2129_v0 = vld [vmem:[%s449_s15] sm:$0xff]  ;;  %s1985_s15 = smov 120   ;;  %v1989_v46 = vmov -1e+30   ;;  %624 = vst.msk [vmem:[#allocation6] sm:$0xff] %vm619_vm4, %v1980_v8  ;;  %625 = vst.msk [vmem:[#allocation6 + $0x8] sm:$0xff] %vm619_vm4, %v1980_v8 }
  0x1e   : > { %v459_v1 = vsel %vm458_vm0, %v2129_v0, 0.0  ;;  %620 = vst.msk [vmem:[#allocation5] sm:$0xff] %vm619_vm4, %v1989_v46  ;;  %621 = vst.msk [vmem:[#allocation5 + $0x8] sm:$0xff] %vm619_vm4, %v1989_v46  ;;  %v839_v49 = vand.u32 127, %v834_v47  ;;  %vm1214_vm7 = vcmask 126016   ;;  %vm1222_vm8 = vcmask 191616  }
  0x1f   : > { %460 = vadd.xlane.f32.xlu0 %v459_v1  ;;  %1694 = vmatpush3.bf16.msra.mxu0 %v1859_v9  ;;  %622 = vst.msk [vmem:[#allocation5 + $0x10] sm:$0xff] %vm619_vm4, %v1989_v46  ;;  %623 = vst.msk [vmem:[#allocation5 + $0x18] sm:$0xff] %vm619_vm4, %v1989_v46  ;;  %vm1230_vm9 = vcmask 257216  }
  0x20   : > { %1699 = vmatprep.subr.bf16.mxu0 %v1980_v8  ;;  %626 = vst.msk [vmem:[#allocation6 + $0x10] sm:$0xff] %vm619_vm4, %v1980_v8  ;;  %627 = vst.msk [vmem:[#allocation6 + $0x18] sm:$0xff] %vm619_vm4, %v1980_v8  ;;  %vm840_vm5 = vcmp.ge.s32.totalorder %v835_v48, %v839_v49 }
  0xa8   : > { %v461_v2 = vpop.xlane.xlu0 %460 }
  0xa9   : > { %v463_v3 = vmul.f32 0.03125, %v461_v2 }
  0xab   : > { %v464_v4 = vsub.f32 %v2129_v0, %v463_v3 }
  0xad   : > { %v465_v5 = vmul.f32 %v464_v4, %v464_v4 }
  0xaf   : > { %v466_v6 = vsel %vm458_vm0, %v465_v5, 0.0 }
  0xb0   : > { %467 = vadd.xlane.f32.xlu0 %v466_v6 }
 0x139   : > { %v468_v10 = vpop.xlane.xlu0 %467 }
 0x13a   : > { %v469_v11 = vmul.f32 0.03125, %v468_v10  ;;  %v1990_v10 = vmov 0  }
 0x13b   : > { %1856 = vset.pattern.permute.xlu1 %v1990_v10  ;;  %1857 = vset.pattern.permute.xlu0 %v1990_v10 }
 0x13c   : > { %v470_v12 = vadd.f32 1e-05, %v469_v11 }
 0x13e   : > { %1872 = vrsqrt.f32 %v470_v12 }
 0x14b   : > { %v1873_v13 = vpop.eup %1872 }
 0x14c   : > { %v472_v15 = vmul.f32 %v1873_v13, %v464_v4 }
 0x14e   : > { %v479_v17 = vmul.f32 %v1612_v14, %v472_v15 }
 0x150   : > { %v486_v18 = vadd.f32 %v1613_v16, %v479_v17  ;;  %v2230_v17 = vld [vmem:[#allocation5] sm:$0xff] }
 0x152   : > { %v487_v19 = vpack.c.bf16 %v486_v18, %v486_v18 }
 0x154   : > { %1696 = vmatmul.mubr.msk.bf16.vlgmr.msra.gmra.mxu0 %vm458_vm0, %v487_v19 }
 0x155   : > { %1701 = vmatprep.mubr.msk.bf16.mxu0 %vm1981_vm1, %v1980_v8 }
 0x214   : > { %v548_v21 = vpop.f32.mrf.mxu0 }
 0x215   : > { %v549_v22 = vadd.f32 %v1614_v20, %v548_v21  ;;  %v847_v21 = vld [vmem:[#allocation5 + $0x10] sm:$0xff] }
 0x216   : > { %v1697_v23 = vpop.f32.mrf.mxu0 }
 0x217   : > { %v2169_v24 = vpack.c.bf16 %v549_v22, %v549_v22  ;;  %v2240_v22 = vld [vmem:[#allocation5 + $0x8] sm:$0xff] }
 0x218   : > { %v551_v25 = vpop.f32.mrf.mxu0 }
 0x219   : > { %588 = vrot.lane.b32.xlu0 %v2169_v24, %s1982_s23  ;;  %560 = vrot.lane.b32.xlu1 %v2169_v24, %s1983_s24  ;;  %556 = vst.msk [vmem:[#allocation2] sm:$0xf] %vm555_vm3, %v2169_v24  ;;  %s1991_s23 = smov 64   ;;  %s1992_s24 = smov 56  }
 0x21a   : > { %v1698_v26 = vpop.f32.mrf.mxu0 }
 0x21d   : > { %573 = vrot.lane.b32.xlu1 %v2169_v24, %s1984_s14  ;;  %s1993_s14 = smov 48  }
 0x220   : > { %v614_v38 = vld [vmem:[#allocation2] sm:$0xf] }
 0x221   : > { %568 = vrot.lane.b32.xlu1 %v2169_v24, %s1985_s15  ;;  %s1994_s15 = smov 40  }
 0x225   : > { %603 = vrot.lane.b32.xlu1 %v2169_v24, %s1986_s17  ;;  %s1998_s17 = smov [#allocation9]  }
 0x226   : > { %s1906_s0 = sshll.u32 %s1998_s17, 4  ;;  %s1907_s0 = int_to_ptr.vmem [resolvable:$false] %s1906_s0 }
 0x227   : > { %s1908_s1 = scalar_lea.vmem %s1907_s0, 256 }
 0x229   : > { %583 = vrot.lane.b32.xlu1 %v2169_v24, %s1987_s19  ;;  %s1650_s19 = sshll.u32 %s1970_s28, 7 }
 0x22a   : > { %s2382_s2 = scalar_lea.hbm %s2442_s13, %s1650_s19 }
 0x22d   : > { %598 = vrot.lane.b32.xlu1 %v2169_v24, %s1988_s22 }
 0x28b   : > { %v589_v27 = vpop.permute.xlu0 %588  ;;  %v561_v28 = vpop.permute.xlu1 %560 }
 0x28c   : > { %592 = vst.msk [vmem:[#allocation3 + $0x8] sm:$0xf] %vm555_vm3, %v589_v27  ;;  %563 = vst.msk [vmem:[#allocation3] sm:$0xf] %vm555_vm3, %v561_v28 }
 0x28f   : > { %v574_v29 = vpop.permute.xlu1 %573 }
 0x290   : > { %577 = vst.msk [vmem:[#allocation3 + $0x4] sm:$0xf] %vm555_vm3, %v574_v29 }
 0x293   : > { %v569_v30 = vpop.permute.xlu1 %568  ;;  %v638_v31 = vld [vmem:[#allocation3] sm:$0xf]  ;;  %v640_v32 = vld [vmem:[#allocation3 + $0x8] sm:$0xf] }
 0x294   : > { %572 = vst.msk [vmem:[#allocation2 + $0x4] sm:$0xf] %vm555_vm3, %v569_v30  ;;  %v650_v33 = vsel %vm628_vm2, %v638_v31, 0  ;;  %v742_v34 = vsel %vm628_vm2, %v640_v32, 0  ;;  %v2251_v30 = vld [vmem:[#allocation5 + $0x18] sm:$0xff] }
 0x295   : > { %1700 = vmatpush3.bf16.xpose.msra.mxu0 %v650_v33  ;;  %1712 = vmatpush3.bf16.xpose.msra.mxu1 %v742_v34 }
 0x296   : > { %1705 = vmatprep.subr.bf16.mxu0 %v1980_v8  ;;  %1723 = vmatprep.subr.bf16.mxu1 %v1980_v8 }
 0x297   : > { %v604_v35 = vpop.permute.xlu1 %603  ;;  %v639_v36 = vld [vmem:[#allocation3 + $0x4] sm:$0xf] }
 0x298   : > { %607 = vst.msk [vmem:[#allocation3 + $0xc] sm:$0xf] %vm555_vm3, %v604_v35  ;;  %v696_v39 = vsel %vm628_vm2, %v639_v36, 0 }
 0x29b   : > { %v584_v37 = vpop.permute.xlu1 %583  ;;  %v615_v42 = vld [vmem:[#allocation2 + $0x4] sm:$0xf] }
 0x29c   : > { %587 = vst.msk [vmem:[#allocation2 + $0x8] sm:$0xf] %vm555_vm3, %v584_v37  ;;  %1702 = vmatmul.mubr.msk.bf16.vlgmr.msra.gmra.mxu0 %vm628_vm2, %v614_v38 }
 0x29d   : > { %1706 = vmatpush3.bf16.xpose.msra.mxu0 %v696_v39  ;;  %1707 = vmatprep.mubr.msk.bf16.mxu0 %vm1981_vm1, %v1980_v8 }
 0x29e   : > { %1717 = vmatprep.subr.bf16.mxu0 %v1980_v8 }
 0x29f   : > { %v599_v40 = vpop.permute.xlu1 %598  ;;  %v641_v41 = vld [vmem:[#allocation3 + $0xc] sm:$0xf] }
 0x2a0   : > { %602 = vst.msk [vmem:[#allocation2 + $0xc] sm:$0xf] %vm555_vm3, %v599_v40  ;;  %v788_v44 = vsel %vm628_vm2, %v641_v41, 0 }
 0x2a3   : > { %v616_v43 = vld [vmem:[#allocation2 + $0x8] sm:$0xf] }
 0x2a4   : > { %1708 = vmatmul.mubr.msk.bf16.vlgmr.msra.gmra.mxu0 %vm628_vm2, %v615_v42  ;;  %1714 = vmatmul.mubr.msk.bf16.vlgmr.msra.gmra.mxu1 %vm628_vm2, %v616_v43 }
 0x2a5   : > { %1718 = vmatpush3.bf16.xpose.msra.mxu0 %v788_v44  ;;  %1719 = vmatprep.mubr.msk.bf16.mxu0 %vm1981_vm1, %v1980_v8 }
 0x2a6   : > { %1725 = vmatprep.mubr.msk.bf16.mxu1 %vm1981_vm1, %v1980_v8  ;;  %1729 = vmatprep.subr.bf16.mxu0 %v1980_v8 }
 0x2a7   : > { %v617_v45 = vld [vmem:[#allocation2 + $0xc] sm:$0xf] }
 0x2ac   : > { %1720 = vmatmul.mubr.msk.bf16.vlgmr.msra.gmra.mxu0 %vm628_vm2, %v617_v45 }
 0x2ad   : > { %1731 = vmatprep.mubr.msk.bf16.mxu0 %vm1981_vm1, %v1980_v8 }
 0x35c   : > { %v686_v50 = vpop.f32.mrf.mxu0 }
 0x35d   : > { %v830_v51 = vmul.f32 0.35355338, %v686_v50 }
 0x35e   : > { %v1703_v52 = vpop.f32.mrf.mxu0 }
 0x35f   : > { %v2220_v53 = vsel %vm840_vm5, %v830_v51, -1e+30 }
 0x360   : > { %v689_v54 = vpop.f32.mrf.mxu0  ;;  %v849_v55 = vsel %vm628_vm2, %v2220_v53, -inf }
 0x361   : > { %850 = vmax.xlane.f32.xlu1 %v849_v55 }
 0x362   : > { %v1704_v56 = vpop.f32.mrf.mxu0 }
 0x364   : > { %v732_v57 = vpop.f32.mrf.mxu0  ;;  %v778_v58 = vpop.f32.mrf.mxu1 }
 0x365   : > { %v831_v59 = vmul.f32 0.35355338, %v732_v57  ;;  %v832_v60 = vmul.f32 0.35355338, %v778_v58 }
 0x366   : > { %v1709_v61 = vpop.f32.mrf.mxu0  ;;  %v1715_v62 = vpop.f32.mrf.mxu1 }
 0x367   : > { %v843_v63 = vsel %vm840_vm5, %v832_v60, -1e+30  ;;  %v842_v1 = vsel %vm840_vm5, %v831_v59, -1e+30 }
 0x368   : > { %v735_v2 = vpop.f32.mrf.mxu0  ;;  %v781_v3 = vpop.f32.mrf.mxu1  ;;  %v855_v4 = vsel %vm628_vm2, %v843_v63, -inf  ;;  %v852_v5 = vsel %vm628_vm2, %v842_v1, -inf }
 0x369   : > { %856 = vmax.xlane.f32.xlu1 %v855_v4  ;;  %853 = vmax.xlane.f32.xlu0 %v852_v5 }
 0x36a   : > { %v1710_v6 = vpop.f32.mrf.mxu0  ;;  %v1716_v7 = vpop.f32.mrf.mxu1 }
 0x36c   : > { %v824_v9 = vpop.f32.mrf.mxu0 }
 0x36d   : > { %v833_v11 = vmul.f32 0.35355338, %v824_v9 }
 0x36e   : > { %v1721_v12 = vpop.f32.mrf.mxu0 }
 0x36f   : > { %v844_v13 = vsel %vm840_vm5, %v833_v11, -1e+30 }
 0x370   : > { %v827_v14 = vpop.f32.mrf.mxu0  ;;  %v858_v15 = vsel %vm628_vm2, %v844_v13, -inf }
 0x371   : > { %859 = vmax.xlane.f32.xlu0 %v858_v15  ;;  %v911_v14 = vld [vmem:[#allocation6 + $0x10] sm:$0xff]  ;;  %v910_v15 = vld [vmem:[#allocation6 + $0x8] sm:$0xff] }
 0x372   : > { %v1722_v16 = vpop.f32.mrf.mxu0 }
 0x3ea   : > { %v851_v18 = vpop.xlane.xlu1 %850 }
 0x3eb   : > { %v2233_v19 = vmax.f32 %v2230_v17, %v851_v18 }
 0x3ed   : > { %v865_v20 = vsub.f32 %v2230_v17, %v2233_v19  ;;  %1162 = vst.msk [vmem:[#allocation5] sm:$0xff] %vm619_vm4, %v2233_v19  ;;  %879 = vperm.xlu1 %1856, %v2233_v19  }
 0x3f2   : > { %v857_v23 = vpop.xlane.xlu1 %856  ;;  %v854_v25 = vpop.xlane.xlu0 %853 }
 0x3f3   : > { %v863_v26 = vmax.f32 %v847_v21, %v857_v23  ;;  %v2243_v27 = vmax.f32 %v2240_v22, %v854_v25 }
 0x3f5   : > { %v867_v28 = vsub.f32 %v847_v21, %v863_v26  ;;  %1164 = vst.msk [vmem:[#allocation5 + $0x10] sm:$0xff] %vm619_vm4, %v863_v26  ;;  %v866_v29 = vsub.f32 %v2240_v22, %v2243_v27  ;;  %1163 = vst.msk [vmem:[#allocation5 + $0x8] sm:$0xff] %vm619_vm4, %v2243_v27  ;;  %889 = vperm.xlu1 %1856, %v863_v26   ;;  %884 = vperm.xlu0 %1857, %v2243_v27   ;;  %v909_v26 = vld [vmem:[#allocation6] sm:$0xff] }
 0x3f7   : > { %v873_v56 = vmul.f32 1.442695, %v867_v28  ;;  %v871_v5 = vmul.f32 1.442695, %v866_v29  ;;  %v912_v29 = vld [vmem:[#allocation6 + $0x18] sm:$0xff] }
 0x3fa   : > { %v860_v31 = vpop.xlane.xlu0 %859 }
 0x3fb   : > { %v864_v32 = vmax.f32 %v2251_v30, %v860_v31 }
 0x3fd   : > { %v868_v33 = vsub.f32 %v2251_v30, %v864_v32  ;;  %1165 = vst.msk [vmem:[#allocation5 + $0x18] sm:$0xff] %vm619_vm4, %v864_v32  ;;  %894 = vperm.xlu1 %1856, %v864_v32  }
 0x401   : > { %564 = vrot.lane.b32.xlu1 %v2169_v24, %s1991_s23 }
 0x405   : > { %578 = vrot.lane.b32.xlu1 %v2169_v24, %s1992_s24  ;;  %s1995_s24 = smov 16  }
 0x409   : > { %593 = vrot.lane.b32.xlu1 %v2169_v24, %s1993_s14  ;;  %s1996_s14 = smov 8  }
 0x40d   : > { %608 = vrot.lane.b32.xlu1 %v2169_v24, %s1994_s15  ;;  %s1997_s15 = smov 24  }
 0x468   : > { %v880_v34 = vpop.permute.xlu1 %879 }
 0x469   : > { %v897_v35 = vsub.f32 %v2220_v53, %v880_v34 }
 0x46b   : > { %v901_v40 = vmul.f32 1.442695, %v897_v35 }
 0x470   : > { %v890_v36 = vpop.permute.xlu1 %889  ;;  %v885_v37 = vpop.permute.xlu0 %884 }
 0x471   : > { %v899_v38 = vsub.f32 %v843_v63, %v890_v36  ;;  %v898_v39 = vsub.f32 %v842_v1, %v885_v37  ;;  %v875_v1 = vmul.f32 1.442695, %v868_v33 }
 0x473   : > { %v905_v41 = vmul.f32 1.442695, %v899_v38  ;;  %v903_v42 = vmul.f32 1.442695, %v898_v39 }
 0x475   : > { %1874 = vpow2.f32 %v905_v41 }
 0x476   : > { %1876 = vpow2.f32 %v903_v42 }
 0x477   : > { %1878 = vpow2.f32 %v901_v40  ;;  %v938_v40 = vld [vmem:[#allocation7 + $0x8] sm:$0xff] }
 0x478   : > { %v895_v43 = vpop.permute.xlu1 %894 }
 0x479   : > { %v900_v44 = vsub.f32 %v844_v13, %v895_v43  ;;  %v869_v13 = vmul.f32 1.442695, %v865_v20 }
 0x47b   : > { %v907_v45 = vmul.f32 1.442695, %v900_v44 }
 0x47c   : > { %v565_v46 = vpop.permute.xlu1 %564 }
 0x47d   : > { %1880 = vpow2.f32 %v907_v45  ;;  %567 = vst.msk [vmem:[#allocation4] sm:$0xf] %vm555_vm3, %v565_v46  ;;  %v939_v46 = vld [vmem:[#allocation7 + $0x10] sm:$0xff] }
 0x47e   : > { %1882 = vpow2.f32 %v873_v56 }
 0x47f   : > { %1884 = vpow2.f32 %v875_v1 }
 0x480   : > { %v579_v24 = vpop.permute.xlu1 %578  ;;  %1886 = vpow2.f32 %v871_v5 }
 0x481   : > { %582 = vst.msk [vmem:[#allocation4 + $0x4] sm:$0xf] %vm555_vm3, %v579_v24  ;;  %1888 = vpow2.f32 %v869_v13  ;;  %v1861_v13 = vld [vmem:[%s2434_s5] sm:$0xff]  }
 0x482   : > { %v1875_v47 = vpop.eup %1874 }
 0x483   : > { %v1877_v48 = vpop.eup %1876  ;;  %v923_v49 = vsel %vm628_vm2, %v1875_v47, 0.0  ;;  %v967_v4 = vpack.c.bf16 %v1875_v47, %v1875_v47 }
 0x484   : > { %v1879_v50 = vpop.eup %1878  ;;  %924 = vadd.xlane.f32.xlu0 %v923_v49  ;;  %v594_v51 = vpop.permute.xlu1 %593  ;;  %v920_v52 = vsel %vm628_vm2, %v1877_v48, 0.0  ;;  %v642_v53 = vld [vmem:[#allocation4] sm:$0xf]  ;;  %v966_v63 = vpack.c.bf16 %v1877_v48, %v1877_v48 }
 0x485   : > { %597 = vst.msk [vmem:[#allocation4 + $0x8] sm:$0xf] %vm555_vm3, %v594_v51  ;;  %921 = vadd.xlane.f32.xlu1 %v920_v52  ;;  %v974_v54 = vsel %vm972_vm6, %v642_v53, 0  ;;  %v965_v55 = vpack.c.bf16 %v1879_v50, %v1879_v50  ;;  %v917_v58 = vsel %vm628_vm2, %v1879_v50, 0.0  ;;  %v940_v53 = vld [vmem:[#allocation7 + $0x18] sm:$0xff] }
 0x486   : > { %1724 = vmatpush3.bf16.msra.mxu1 %v974_v54 }
 0x487   : > { %1735 = vmatprep.subr.bf16.mxu1 %v1980_v8 }
 0x488   : > { %v609_v57 = vpop.permute.xlu1 %608  ;;  %v643_v59 = vld [vmem:[#allocation4 + $0x4] sm:$0xf] }
 0x489   : > { %612 = vst.msk [vmem:[#allocation4 + $0xc] sm:$0xf] %vm555_vm3, %v609_v57  ;;  %918 = vadd.xlane.f32.xlu1 %v917_v58  ;;  %1726 = vmatmul.mubr.msk.bf16.vlgmr.msra.gmra.mxu1 %vm628_vm2, %v965_v55  ;;  %v1020_v60 = vsel %vm972_vm6, %v643_v59, 0 }
 0x48a   : > { %v1881_v61 = vpop.eup %1880  ;;  %1730 = vmatpush3.bf16.msra.mxu0 %v1020_v60  ;;  %1737 = vmatprep.mubr.msk.bf16.mxu1 %vm1981_vm1, %v1980_v8 }
 0x48b   : > { %v926_v62 = vsel %vm628_vm2, %v1881_v61, 0.0  ;;  %1741 = vmatprep.subr.bf16.mxu0 %v1980_v8  ;;  %v968_v9 = vpack.c.bf16 %v1881_v61, %v1881_v61  ;;  %v1883_v10 = vpop.eup %1882 }
 0x48c   : > { %927 = vadd.xlane.f32.xlu0 %v926_v62  ;;  %v644_v2 = vld [vmem:[#allocation4 + $0x8] sm:$0xf]  ;;  %v1885_v11 = vpop.eup %1884  ;;  %v915_v16 = vmul.f32 %v1883_v10, %v911_v14 }
 0x48d   : > { %1732 = vmatmul.mubr.msk.bf16.vlgmr.msra.gmra.mxu0 %vm628_vm2, %v966_v63  ;;  %v1066_v3 = vsel %vm972_vm6, %v644_v2, 0  ;;  %v1887_v12 = vpop.eup %1886  ;;  %v916_v19 = vmul.f32 %v1885_v11, %v912_v29 }
 0x48e   : > { %1736 = vmatpush3.bf16.msra.mxu1 %v1066_v3  ;;  %1743 = vmatprep.mubr.msk.bf16.mxu0 %vm1981_vm1, %v1980_v8  ;;  %v914_v18 = vmul.f32 %v1887_v12, %v910_v15  ;;  %v1889_v22 = vpop.eup %1888 }
 0x48f   : > { %1747 = vmatprep.subr.bf16.mxu1 %v1980_v8  ;;  %v913_v28 = vmul.f32 %v1889_v22, %v909_v26 }
 0x490   : > { %v645_v6 = vld [vmem:[#allocation4 + $0xc] sm:$0xf] }
 0x491   : > { %1738 = vmatmul.mubr.msk.bf16.vlgmr.msra.gmra.mxu1 %vm628_vm2, %v967_v4  ;;  %v1112_v7 = vsel %vm972_vm6, %v645_v6, 0  ;;  %v1860_v6 = vld [vmem:[%s2434_s5 + $0x8] sm:$0xff]  }
 0x492   : > { %1742 = vmatpush3.bf16.msra.mxu0 %v1112_v7  ;;  %1751 = vmatprep.mubr.msk.bf16.mxu1 %vm1981_vm1, %v1980_v8 }
 0x493   : > { %1755 = vmatprep.subr.bf16.mxu0 %v1980_v8  ;;  %1748 = vmatpush3.bf16.msra.mxu1 %v1860_v6 }
 0x494   : > { %1749 = vmatprep.subr.bf16.mxu1 %v1980_v8 }
 0x495   : > { %1744 = vmatmul.mubr.msk.bf16.vlgmr.msra.gmra.mxu0 %vm628_vm2, %v968_v9 }
 0x496   : > { %1759 = vmatprep.mubr.msk.bf16.mxu0 %vm1981_vm1, %v1980_v8 }
 0x497   : > { %1750 = vmatpush3.bf16.msra.mxu1 %v1861_v13 }
 0x498   : > { %1763 = vmatprep.subr.bf16.mxu1 %v1980_v8 }
 0x49a   : > { %953 = vperm.xlu1 %1856, %v1883_v10  }
 0x49e   : > { %958 = vperm.xlu1 %1856, %v1885_v11  }
 0x4a2   : > { %948 = vperm.xlu0 %1857, %v1887_v12   ;;  %v937_v12 = vld [vmem:[#allocation7] sm:$0xff] }
 0x50d   : > { %v925_v21 = vpop.xlane.xlu0 %924 }
 0x50e   : > { %v922_v23 = vpop.xlane.xlu1 %921  ;;  %v931_v25 = vadd.f32 %v925_v21, %v915_v16 }
 0x50f   : > { %v930_v27 = vadd.f32 %v922_v23, %v914_v18 }
 0x510   : > { %935 = vst.msk [vmem:[#allocation6 + $0x10] sm:$0xff] %vm619_vm4, %v931_v25 }
 0x511   : > { %934 = vst.msk [vmem:[#allocation6 + $0x8] sm:$0xff] %vm619_vm4, %v930_v27 }
 0x512   : > { %v919_v30 = vpop.xlane.xlu1 %918 }
 0x513   : > { %v929_v17 = vadd.f32 %v919_v30, %v913_v28 }
 0x515   : > { %933 = vst.msk [vmem:[#allocation6] sm:$0xff] %vm619_vm4, %v929_v17  ;;  %v928_v20 = vpop.xlane.xlu0 %927 }
 0x516   : > { %v932_v31 = vadd.f32 %v928_v20, %v916_v19  ;;  %v954_v43 = vpop.permute.xlu1 %953 }
 0x517   : > { %v1168_v32 = vld [vmem:[#allocation6 + $0x10] sm:$0xff]  ;;  %v963_v51 = vmul.f32 %v954_v43, %v939_v46 }
 0x518   : > { %936 = vst.msk [vmem:[#allocation6 + $0x18] sm:$0xff] %vm619_vm4, %v932_v31  ;;  %v1167_v33 = vld [vmem:[#allocation6 + $0x8] sm:$0xff]  ;;  %1890 = vrcp.f32 %v1168_v32  ;;  %v1630_v32 = vld [vmem:[%s2435_s6] ss:$0 sm:$0xff] }
 0x519   : > { %1892 = vrcp.f32 %v1167_v33 }
 0x51a   : > { %v959_v52 = vpop.permute.xlu1 %958 }
 0x51b   : > { %v964_v59 = vmul.f32 %v959_v52, %v940_v53 }
 0x51c   : > { %v1166_v35 = vld [vmem:[#allocation6] sm:$0xff] }
 0x51d   : > { %v949_v41 = vpop.permute.xlu0 %948 }
 0x51e   : > { %v962_v45 = vmul.f32 %v949_v41, %v938_v40 }
 0x51f   : > { %v1169_v34 = vld [vmem:[#allocation6 + $0x18] sm:$0xff] }
 0x520   : > { %1894 = vrcp.f32 %v1169_v34 }
 0x521   : > { %1896 = vrcp.f32 %v1166_v35 }
 0x525   : > { %v1891_v36 = vpop.eup %1890 }
 0x526   : > { %v1893_v37 = vpop.eup %1892  ;;  %1190 = vperm.xlu1 %1856, %v1891_v36  }
 0x527   : > { %1185 = vperm.xlu0 %1857, %v1893_v37  }
 0x52a   : > { %943 = vperm.xlu1 %1856, %v1889_v22  }
 0x52d   : > { %v1895_v38 = vpop.eup %1894 }
 0x52e   : > { %1195 = vperm.xlu0 %1857, %v1895_v38   ;;  %v1897_v39 = vpop.eup %1896 }
 0x532   : > { %1180 = vperm.xlu0 %1857, %v1897_v39  }
 0x549   : > { %v1010_v42 = vpop.f32.mrf.mxu1 }
 0x54b   : > { %v1727_v44 = vpop.f32.mrf.mxu1 }
 0x54d   : > { %v1013_v24 = vpop.f32.mrf.mxu1  ;;  %v1056_v47 = vpop.f32.mrf.mxu0 }
 0x54e   : > { %v1155_v48 = vadd.f32 %v1056_v47, %v962_v45  ;;  %v1862_v45 = vld [vmem:[%s2438_s9 + $0x8] sm:$0xff]  }
 0x54f   : > { %v1728_v49 = vpop.f32.mrf.mxu1  ;;  %v1733_v50 = vpop.f32.mrf.mxu0  ;;  %1756 = vmatpush3.bf16.msra.mxu0 %v1862_v45 }
 0x550   : > { %1159 = vst.msk [vmem:[#allocation7 + $0x8] sm:$0xff] %vm628_vm2, %v1155_v48  ;;  %1757 = vmatprep.subr.bf16.mxu0 %v1980_v8  ;;  %v1634_v49 = vld [vmem:[%s2436_s7] ss:$0 sm:$0xff] }
 0x551   : > { %v1059_v54 = vpop.f32.mrf.mxu0  ;;  %v1102_v55 = vpop.f32.mrf.mxu1 }
 0x552   : > { %v1156_v56 = vadd.f32 %v1102_v55, %v963_v51  ;;  %v1635_v51 = vld [vmem:[%s2437_s8] ss:$0 sm:$0xff]  ;;  %v1864_v55 = vld [vmem:[%s2440_s11 + $0x38] sm:$0xff]  }
 0x553   : > { %v1734_v57 = vpop.f32.mrf.mxu0  ;;  %v1739_v58 = vpop.f32.mrf.mxu1 }
 0x554   : > { %1160 = vst.msk [vmem:[#allocation7 + $0x10] sm:$0xff] %vm628_vm2, %v1156_v56  ;;  %v1865_v56 = vld [vmem:[%s2440_s11 + $0x30] sm:$0xff]   ;;  %v1866_v57 = vld [vmem:[%s2440_s11 + $0x28] sm:$0xff]   ;;  %v1867_v58 = vld [vmem:[%s2440_s11 + $0x20] sm:$0xff]  }
 0x555   : > { %v1105_v60 = vpop.f32.mrf.mxu1  ;;  %v1148_v61 = vpop.f32.mrf.mxu0 }
 0x556   : > { %v1157_v62 = vadd.f32 %v1148_v61, %v964_v59  ;;  %v1868_v59 = vld [vmem:[%s2440_s11 + $0x18] sm:$0xff]   ;;  %v1869_v60 = vld [vmem:[%s2440_s11 + $0x10] sm:$0xff]   ;;  %v1870_v61 = vld [vmem:[%s2440_s11 + $0x8] sm:$0xff]  }
 0x557   : > { %v1740_v63 = vpop.f32.mrf.mxu1  ;;  %v1745_v1 = vpop.f32.mrf.mxu0  ;;  %v1175_v10 = vld [vmem:[#allocation7 + $0x8] sm:$0xff] }
 0x558   : > { %1161 = vst.msk [vmem:[#allocation7 + $0x18] sm:$0xff] %vm628_vm2, %v1157_v62  ;;  %v1871_v62 = vld [vmem:[%s2440_s11] sm:$0xff]  }
 0x559   : > { %v1151_v2 = vpop.f32.mrf.mxu0  ;;  %v1636_v63 = vld [vmem:[%s2439_s10] ss:$0 sm:$0xff] }
 0x55b   : > { %v1746_v3 = vpop.f32.mrf.mxu0  ;;  %v1176_v4 = vld [vmem:[#allocation7 + $0x10] sm:$0xff] }
 0x55f   : > { %v1177_v23 = vld [vmem:[#allocation7 + $0x18] sm:$0xff] }
 0x5a1   : > { %v1191_v5 = vpop.permute.xlu1 %1190 }
 0x5a2   : > { %v1200_v7 = vmul.f32 %v1191_v5, %v1176_v4  ;;  %v1186_v9 = vpop.permute.xlu0 %1185 }
 0x5a3   : > { %v1199_v11 = vmul.f32 %v1186_v9, %v1175_v10 }
 0x5a4   : > { %v1655_v14 = vpack.c.bf16 %v1200_v7, %v1200_v7 }
 0x5a5   : > { %v1654_v15 = vpack.c.bf16 %v1199_v11, %v1199_v11  ;;  %v944_v16 = vpop.permute.xlu1 %943 }
 0x5a6   : > { %v961_v18 = vmul.f32 %v944_v16, %v937_v12  ;;  %1219 = vrot.lane.b32.xlu0 %v1655_v14, %s1995_s24 }
 0x5a7   : > { %1211 = vrot.lane.b32.xlu1 %v1654_v15, %s1996_s14  ;;  %s443_s14 = sand.u32 1, %s1962_s26  }
 0x5a8   : > { %v1154_v21 = vadd.f32 %v1010_v42, %v961_v18  ;;  %v1648_v18 = vld [vmem:[%s2441_s12] ss:$0 sm:$0xff]  ;;  %s1523_s28 = scalar_lea.sflag [#allocation10], %s443_s14 }
 0x5a9   : > { %v1196_v22 = vpop.permute.xlu0 %1195 }
 0x5aa   : > { %1158 = vst.msk [vmem:[#allocation7] sm:$0xff] %vm628_vm2, %v1154_v21  ;;  %v1201_v25 = vmul.f32 %v1196_v22, %v1177_v23 }
 0x5ac   : > { %v1656_v26 = vpack.c.bf16 %v1201_v25, %v1201_v25 }
 0x5ad   : > { %v1181_v28 = vpop.permute.xlu0 %1180 }
 0x5ae   : > { %1227 = vrot.lane.b32.xlu1 %v1656_v26, %s1997_s15  ;;  %s1610_s15 = sshll.u32 %s443_s14, 3 }
 0x5af   : > { %s445_s22 = scalar_lea.vmem [#allocation9], %s1610_s15 }
 0x5b0   : > { %s1537_s23 = sshll.u32 %s445_s22, 4  ;;  %s2384_s23 = int_to_ptr.vmem [resolvable:$true] %s1537_s23 }
 0x5b1   : > { %v1174_v27 = vld [vmem:[#allocation7] sm:$0xff]  ;;  %s1902_s15 = scalar_lea.vmem %s2384_s23, 128  ;;  %p1909_p1 = scmp.lt.s32.totalorder %s2384_s23, %s1907_s0 }
 0x5b2   : > { %v1198_v29 = vmul.f32 %v1181_v28, %v1174_v27  ;;  %p1903_p12 = scmp.ne.s32.totalorder %s2384_s23, %s1902_s15  ;;  %p1910_p2 = scmp.lt.s32.totalorder %s1908_s1, %s1902_s15 }
 0x5b4   : > { %v1202_v30 = vpack.c.bf16 %v1198_v29, %v1198_v29  ;;  %p1904_p13 = pnand %p1903_p12, %p2109_p4  ;;  %p1911_p3 = por %p1910_p2, %p1909_p1 }
 0x5b6   : > { %1207 = vst.msk [vmem:[#allocation8] sm:$0xf] %vm555_vm3, %v1202_v30  ;;  %p1905_p0 = pneg %p1904_p13 }
 0x5b8   : > { %p1912_p5 = pnand %p1911_p3, %p1905_p0 }
 0x618   : > { %v1220_v17 = vpop.permute.xlu0 %1219 }
 0x619   : > { %v1212_v19 = vpop.permute.xlu1 %1211 }
 0x61a   : > { %1215 = vst.msk [vmem:[#allocation8] sm:$0xf] %vm1214_vm7, %v1212_v19 }
 0x61b   : > { %1223 = vst.msk [vmem:[#allocation8] sm:$0xf] %vm1222_vm8, %v1220_v17 }
 0x620   : > { %v1228_v20 = vpop.permute.xlu1 %1227 }
 0x621   : > { %1231 = vst.msk [vmem:[#allocation8] sm:$0xf] %vm1230_vm9, %v1228_v20 }
 0x628   : > { %v1232_v31 = vld [vmem:[#allocation8] sm:$0xf] }
 0x629   : > { %1752 = vmatmul.mubr.msk.bf16.vlgmr.msra.gmra.mxu1 %vm458_vm0, %v1232_v31 }
 0x62a   : > { %1779 = vmatprep.mubr.msk.bf16.mxu1 %vm1981_vm1, %v1980_v8  ;;  %1764 = vmatpush3.bf16.msra.mxu1 %v1864_v55 }
 0x62b   : > { %1765 = vmatprep.subr.bf16.mxu1 %v1980_v8 }
 0x62e   : > { %1766 = vmatpush3.bf16.msra.mxu1 %v1865_v56 }
 0x62f   : > { %1767 = vmatprep.subr.bf16.mxu1 %v1980_v8 }
 0x632   : > { %1768 = vmatpush3.bf16.msra.mxu1 %v1866_v57 }
 0x633   : > { %1769 = vmatprep.subr.bf16.mxu1 %v1980_v8 }
 0x636   : > { %1770 = vmatpush3.bf16.msra.mxu1 %v1867_v58 }
 0x637   : > { %1771 = vmatprep.subr.bf16.mxu1 %v1980_v8 }
 0x63a   : > { %1772 = vmatpush3.bf16.msra.mxu1 %v1868_v59 }
 0x63b   : > { %1773 = vmatprep.subr.bf16.mxu1 %v1980_v8 }
 0x63e   : > { %1774 = vmatpush3.bf16.msra.mxu1 %v1869_v60 }
 0x63f   : > { %1775 = vmatprep.subr.bf16.mxu1 %v1980_v8 }
 0x642   : > { %1776 = vmatpush3.bf16.msra.mxu1 %v1870_v61 }
 0x643   : > { %1777 = vmatprep.subr.bf16.mxu1 %v1980_v8 }
 0x646   : > { %1778 = vmatpush3.bf16.msra.mxu1 %v1871_v62 }
 0x6e9   : > { %v1294_v33 = vpop.f32.mrf.mxu1 }
 0x6ea   : > { %v1295_v34 = vadd.f32 %v1630_v32, %v1294_v33 }
 0x6eb   : > { %v1753_v35 = vpop.f32.mrf.mxu1 }
 0x6ec   : > { %v2319_v36 = vadd.f32 %v1295_v34, %v2129_v0  ;;  %v1863_v0 = vld [vmem:[%s2438_s9] sm:$0xff]  }
 0x6ed   : > { %v1297_v37 = vpop.f32.mrf.mxu1  ;;  %1758 = vmatpush3.bf16.msra.mxu0 %v1863_v0 }
 0x6ee   : > { %v1303_v38 = vsel %vm458_vm0, %v2319_v36, 0.0 }
 0x6ef   : > { %1304 = vadd.xlane.f32.xlu0 %v1303_v38  ;;  %v1754_v39 = vpop.f32.mrf.mxu1 }
 0x778   : > { %v1305_v40 = vpop.xlane.xlu0 %1304 }
 0x779   : > { %v1307_v41 = vmul.f32 0.03125, %v1305_v40 }
 0x77b   : > { %v1308_v42 = vsub.f32 %v2319_v36, %v1307_v41 }
 0x77d   : > { %v1309_v43 = vmul.f32 %v1308_v42, %v1308_v42 }
 0x77f   : > { %v1310_v44 = vsel %vm458_vm0, %v1309_v43, 0.0 }
 0x780   : > { %1311 = vadd.xlane.f32.xlu1 %v1310_v44 }
 0x809   : > { %v1312_v46 = vpop.xlane.xlu1 %1311 }
 0x80a   : > { %v1313_v24 = vmul.f32 0.03125, %v1312_v46 }
 0x80c   : > { %v1314_v47 = vadd.f32 1e-05, %v1313_v24 }
 0x80e   : > { %1898 = vrsqrt.f32 %v1314_v47 }
 0x81b   : > { %v1899_v48 = vpop.eup %1898 }
 0x81c   : > { %v1316_v50 = vmul.f32 %v1899_v48, %v1308_v42 }
 0x81e   : > { %v1323_v52 = vmul.f32 %v1634_v49, %v1316_v50 }
 0x820   : > { %v1330_v53 = vadd.f32 %v1635_v51, %v1323_v52 }
 0x822   : > { %v1331_v54 = vpack.c.bf16 %v1330_v53, %v1330_v53 }
 0x824   : > { %1760 = vmatmul.mubr.msk.bf16.vlgmr.msra.gmra.mxu0 %vm458_vm0, %v1331_v54 }
 0x8e4   : > { %v1392_v1 = vpop.f32.mrf.mxu0 }
 0x8e5   : > { %v1393_v2 = vadd.f32 %v1636_v63, %v1392_v1 }
 0x8e6   : > { %v1761_v3 = vpop.f32.mrf.mxu0 }
 0x8e7   : > { %v1399_v4 = vmul.f32 0.044715, %v1393_v2  ;;  %v1398_v8 = vmul.f32 0.5, %v1393_v2 }
 0x8e8   : > { %v1395_v5 = vpop.f32.mrf.mxu0 }
 0x8e9   : > { %v1400_v6 = vmul.f32 %v1399_v4, %v1393_v2 }
 0x8ea   : > { %v1762_v7 = vpop.f32.mrf.mxu0 }
 0x8eb   : > { %v1401_v9 = vmul.f32 %v1400_v6, %v1393_v2 }
 0x8ed   : > { %v1402_v10 = vadd.f32 %v1401_v9, %v1393_v2 }
 0x8ef   : > { %v1403_v11 = vmul.f32 0.7978846, %v1402_v10 }
 0x8f1   : > { %1900 = vtanh.f32 %v1403_v11 }
 0x8fe   : > { %v1901_v12 = vpop.eup %1900 }
 0x8ff   : > { %v1405_v13 = vadd.f32 1.0, %v1901_v12 }
 0x901   : > { %v1406_v14 = vmul.f32 %v1405_v13, %v1398_v8 }
 0x903   : > { %v1407_v15 = vpack.c.bf16 %v1406_v14, %v1406_v14 }
 0x905   : > { %1780 = vmatmul.mubr.bf16.vlgmr.msra.gmra.mxu1 %v1407_v15 }
 0x9c5   : > { %v1506_v16 = vpop.f32.mrf.mxu1 }
 0x9c6   : > { %v1512_v21 = vadd.f32 %v1506_v16, %v2319_v36 }
 0x9c7   : > { %v1781_v22 = vpop.f32.mrf.mxu1 }
 0x9c8   : > { %v1520_v23 = vadd.f32 %v1648_v18, %v1512_v21 }
 0x9c9   : > { %v1509_v25 = vpop.f32.mrf.mxu1 }
 0x9ca   : > { %1521 = vst.msk [vmem:[%s445_s22] sm:$0xff] %vm458_vm0, %v1520_v23 }
 0x9cb   : > { %v1782_v26 = vpop.f32.mrf.mxu1 }
 0x9cc   : > { %1915 = shalt.err (!%p1912_p5)
}
 0x9cd   : > { %s1916_s19 = scalar_lea.hbm %s2382_s2, 128  ;;  %s1920_s24 = scalar_lea.hbm %s2442_s13, 256 }
 0x9ce   : > { %p1917_p6 = scmp.ne.s32.totalorder %s2382_s2, %s1916_s19  ;;  %p1921_p10 = scmp.lt.s32.totalorder %s2382_s2, %s2442_s13 }
 0x9cf   : > { %p1922_p11 = scmp.lt.s32.totalorder %s1920_s24, %s1916_s19 }
 0x9d0   : > { %p1918_p7 = pnand %p1917_p6, %p2109_p4 }
 0x9d1   : > { %p1923_p12 = por %p1922_p11, %p1921_p10 }
 0x9d2   : > { %p1919_p9 = pneg %p1918_p7 }
 0x9d4   : > { %p1924_p13 = pnand %p1923_p12, %p1919_p9 }
 0x9d6   : > { %1927 = shalt.err (!%p1924_p13)
}
 0x9d7   : > { %1783 = dma.vmem_to_hbm [thread:$0]  (%p2109_p4), %s2384_s23, 128, %s2382_s2, %s1523_s28  }
 0x9d8 PF: > { %p1789_p0 = scmp.ge.s32.totalorder %s1978_s30, 2  ;;  %s1549_s15 = sand.u32 1, %s1958_s25  }
 0x9d9   : > { %s1550_s3 = scalar_lea.sflag [#allocation10], %s1549_s15 }
 0x9da   : > { %p1786_p1 = pnand %p1789_p0, %p2116_p8 }
 0x9dc   : > { %p1787_p2 = pneg %p1786_p1 }
 0x9de   : > { %1953 = dma.done.wait (%p1787_p2), %s1550_s3, 128  }
 0x9df   : > { %1955 = vsyncadd (%p1787_p2), %s1550_s3, 4294967168  ;;  %s26_s30 = sadd.s32 1, %s1978_s30   ;;  %s2453_s25 = smov %s1962_s26 }
 0x9e0   : > { %p23_p3 = scmp.ge.s32.totalorder %s26_s30, 4   ;;  %s2454_s26 = smov %s1966_s27 }
 0x9e1   : > { %s2455_s27 = smov %s2122_s21  ;;  %s2456_s28 = smov %s1974_s29 }
 0x9e2   : > { %s2457_s29 = smov %s2459_s16  ;;  %25 = sbr.rel (!%p23_p3) target bundleno = 9 (0x9), region = 124 }
 0x9e7   :  { %1555 = vsyncpa [#allocation10], 1 }
 0x9e8   :  { %1557 = vsyncpa [#allocation10 + $0x1], 1 }

</bundles_post_ra>
